<compile_context>
chip_gen: v7x
topology: tpu7x:2x2x1
jax: 0.10.0
libtpu: 0.0.40
codegen_flags: <defaults>
</compile_context>

<pallas_src>
import functools

import jax
import jax.numpy as jnp
from jax.experimental import pallas as pl
from jax.experimental.pallas import tpu as pltpu


def _mamba_kernel(x_ref, w_x_ref, w_z_ref, conv_w_ref, conv_b_ref,
                  w_b_ref, w_c_ref, a_ref, a_t_ref, d_ref, w_out_ref,
                  o_ref, *, seq_len, compute_dtype):
    rows = x_ref.shape[0]                       # block_b * L
    n_seq = rows // seq_len
    d_state = a_ref.shape[1]
    K = conv_w_ref.shape[0]
    cd = compute_dtype

    # ---- in_proj: two lane-contiguous dots (x branch / gate branch) ----
    x = x_ref[...].astype(cd)
    x_p = jnp.dot(x, w_x_ref[...], preferred_element_type=jnp.float32)
    z = jnp.dot(x, w_z_ref[...], preferred_element_type=jnp.float32)

    # ---- depthwise causal conv (kernel K, left pad K-1) via XLU rolls ----
    cw = conv_w_ref[...]                        # [K, d_inner], f32
    acc = x_p * cw[K - 1:K, :]                  # lag-0 tap: no shift, no mask
    row_id = jax.lax.broadcasted_iota(jnp.int32, (rows, 1), 0)
    if seq_len & (seq_len - 1) == 0:            # hoisted in-sequence position
        pos = jnp.bitwise_and(row_id, seq_len - 1)
    else:
        pos = jax.lax.rem(row_id, seq_len)
    for j in range(1, K):                       # static unroll (K == 4)
        shifted = pltpu.roll(x_p, shift=j, axis=0)      # shifted[t] = x_p[t-j]
        shifted = jnp.where(pos < j, 0.0, shifted)      # causal, no cross-seq leak
        acc = acc + cw[K - 1 - j:K - j, :] * shifted
    acc = acc + conv_b_ref[...]
    x_conv = acc * jax.nn.sigmoid(acc)          # SiLU, f32 on VPU/EUP

    # ---- x_proj (B, C) and folded state matrix A: lane-contiguous dots ----
    xc = x_conv.astype(cd)
    b_proj = jnp.dot(xc, w_b_ref[...], preferred_element_type=jnp.float32)
    c_proj = jnp.dot(xc, w_c_ref[...], preferred_element_type=jnp.float32)
    a_proj = jnp.dot(xc, a_ref[...], preferred_element_type=jnp.float32)

    # per-sequence global_state: mean_t(x_conv) @ A == mean_t(x_conv @ A)
    # (single f32 sublane reduction; broadcast folded into state_mod)
    gs = jnp.mean(a_proj.reshape(n_seq, seq_len, d_state), axis=1, keepdims=True)
    bc3 = (b_proj * c_proj).reshape(n_seq, seq_len, d_state)
    state_mod = (gs * bc3).reshape(rows, d_state)

    scan = jnp.dot(state_mod.astype(cd), a_t_ref[...],
                   preferred_element_type=jnp.float32)
    scan = scan + x_conv * d_ref[...]

    # ---- gate + out_proj ----
    y = scan * (z * jax.nn.sigmoid(z))
    o_ref[...] = jnp.dot(y.astype(cd), w_out_ref[...],
                         preferred_element_type=jnp.float32).astype(o_ref.dtype)


def _pick_block_b(batch, seq_len, requested, max_rows):
    """Largest block_b dividing `batch` with sublane-aligned rows that fits VMEM."""
    cap = max(1, min(batch, max_rows // max(seq_len, 1)))
    if requested is not None:
        cap = min(cap, max(1, int(requested)))
    elif batch >= 2:
        cap = min(cap, batch // 2)     # keep grid >= 2 so megacore/v7x can shard
    for b in range(cap, 0, -1):
        if batch % b == 0 and (b * seq_len) % 8 == 0:
            return b
    return batch                        # full-batch block == full array dims: always legal


def simplified_mamba(x, params, *, compute_dtype=jnp.bfloat16, block_b=None,
                     out_dtype=None):
    """Forward pass of SimplifiedMamba.  x: [B, L, D]."""
    B, L, D = x.shape
    d_inner = params["D_vec"].shape[-1]
    d_state = params["A"].shape[-1]
    cd = jnp.dtype(compute_dtype)
    od = jnp.dtype(x.dtype if out_dtype is None else out_dtype)

    # Weights pre-transposed to [in, out]; MXU operands cast once to cd
    # (cheap here; in a real model precompute these outside the step fn).
    w_x = params["w_in"][:, :d_inner].astype(cd)
    w_z = params["w_in"][:, d_inner:].astype(cd)
    w_b = params["w_bc"][:, :d_state].astype(cd)
    w_c = params["w_bc"][:, d_state:].astype(cd)
    a_m = params["A"].astype(cd)                  # [d_inner, d_state]
    a_t = params["A"].T.astype(cd)                # [d_state, d_inner]
    w_out = params["w_out"].astype(cd)            # [d_inner, D]
    conv_w = params["conv_w"].astype(jnp.float32)  # [K, d_inner]
    conv_b = params["conv_b"].astype(jnp.float32)  # [1, d_inner]
    d_vec = params["D_vec"].astype(jnp.float32)    # [1, d_inner]
    weights = (w_x, w_z, conv_w, conv_b, w_b, w_c, a_m, a_t, d_vec, w_out)

    def _nbytes(a):
        return int(a.size) * a.dtype.itemsize
    weight_bytes = sum(_nbytes(w) for w in weights)

    # Per-generation VMEM capacity (v5e/v6e: 128 MiB, v7x: 64 MiB per core).
    try:
        vmem_cap = int(pltpu.get_tpu_info().vmem_capacity_bytes)
    except Exception:
        vmem_cap = 64 * 1024 * 1024

    # Conservative per-row footprint: live f32 intermediates + cd/out IO.
    per_row = (4 * (6 * d_inner + 5 * d_state)
               + 2 * D * (cd.itemsize + od.itemsize))
    act_budget = max(vmem_cap // 2 - 2 * weight_bytes, 8 * per_row)
    max_rows = min(max(act_budget // per_row, 8), 1024)
    block_b = _pick_block_b(B, L, block_b, max_rows)
    rows = block_b * L
    grid = (B // block_b,)

    x2 = x.reshape(B * L, D).astype(cd)   # cd slab halves recurring HBM traffic

    # Explicit scoped-VMEM budget: weights (worst case double-buffered) +
    # double-buffered IO blocks + f32 intermediates + headroom, clamped.
    vmem_limit = (2 * weight_bytes
                  + 2 * rows * D * (cd.itemsize + od.itemsize)
                  + rows * 4 * (6 * d_inner + 5 * d_state)
                  + (8 << 20))
    vmem_limit = int(min(max(vmem_limit, 32 << 20), (3 * vmem_cap) // 4))

    kernel = functools.partial(_mamba_kernel, seq_len=L, compute_dtype=cd)

    def _build(single_buffer_weights):
        def _wspec(a):
            nd = a.ndim
            idx = lambda i, _nd=nd: (0,) * _nd      # resident across whole grid
            if single_buffer_weights:
                # Constant-index weights never re-DMA: single buffer halves
                # their VMEM footprint (frees slab room on v7x's 64 MiB VMEM).
                return pl.BlockSpec(a.shape, idx, pipeline_mode=pl.Buffered(1))
            return pl.BlockSpec(a.shape, idx)

        grid_spec = pltpu.PrefetchScalarGridSpec(
            num_scalar_prefetch=0,
            grid=grid,
            in_specs=[pl.BlockSpec((rows, D), lambda i: (i, 0))]
                     + [_wspec(w) for w in weights],
            out_specs=pl.BlockSpec((rows, D), lambda i: (i, 0)),
        )
        return pl.pallas_call(
            kernel,
            out_shape=jax.ShapeDtypeStruct((B * L, D), od),
            grid_spec=grid_spec,
            compiler_params=pltpu.CompilerParams(
                dimension_semantics=("parallel",),   # batch blocks shard across TCs
                vmem_limit_bytes=vmem_limit),
        )

    try:
        out2 = _build(True)(x2, *weights)
    except Exception:
        # Fallback for toolchains without pipeline_mode / Buffered(1) support.
        out2 = _build(False)(x2, *weights)
    return out2.reshape(B, L, D)


def reference_forward(x, params):
    """Pure-JAX f32 reference mirroring the PyTorch module."""
    d_inner = params["D_vec"].shape[-1]
    d_state = params["A"].shape[-1]
    xz = x @ params["w_in"]
    x_p, z = xz[..., :d_inner], xz[..., d_inner:]
    K = params["conv_w"].shape[0]
    B, L, _ = x_p.shape
    x_pad = jnp.concatenate(
        [jnp.zeros((B, K - 1, d_inner), x_p.dtype), x_p], axis=1)
    acc = jnp.broadcast_to(params["conv_b"], (B, L, d_inner)).astype(x_p.dtype)
    for k in range(K):
        acc = acc + params["conv_w"][k][None, None, :] * x_pad[:, k:k + L, :]
    x_conv = acc * jax.nn.sigmoid(acc)
    # NOTE: dt = softplus(dt_proj(x_conv)) is dead code in the PyTorch module.
    b_proj = x_conv @ params["w_bc"][:, :d_state]
    c_proj = x_conv @ params["w_bc"][:, d_state:]
    gt = jnp.mean(x_conv, axis=1)                  # [B, d_inner]
    gs = gt @ params["A"]                          # [B, d_state]
    state_mod = gs[:, None, :] * b_proj * c_proj
    scan = state_mod @ params["A"].T + x_conv * params["D_vec"]
    y = scan * (z * jax.nn.sigmoid(z))
    return y @ params["w_out"]


def init_params(key, d_model, d_state=16, d_conv=4, expand=2):
    d_inner = int(expand * d_model)
    ks = jax.random.split(key, 5)
    s_in = 1.0 / jnp.sqrt(d_model)
    s_inner = 1.0 / jnp.sqrt(d_inner)
    w_in = jax.random.normal(ks[0], (d_model, 2 * d_inner), jnp.float32) * s_in
    conv_w = jax.random.normal(ks[1], (d_conv, d_inner), jnp.float32) * (1.0 / d_conv)
    conv_b = jax.random.normal(ks[2], (1, d_inner), jnp.float32) * 0.1
    w_bc = jax.random.normal(ks[3], (d_inner, 2 * d_state), jnp.float32) * s_inner
    w_out = jax.random.normal(ks[4], (d_inner, d_model), jnp.float32) * s_inner
    # A_log = log(arange(1..d_state)) per channel; A = -exp(A_log)
    a_row = jnp.arange(1, d_state + 1, dtype=jnp.float32)
    A = -jnp.broadcast_to(a_row[None, :], (d_inner, d_state))
    D_vec = jnp.ones((1, d_inner), jnp.float32)
    return {"w_in": w_in, "conv_w": conv_w, "conv_b": conv_b,
            "w_bc": w_bc, "A": A, "D_vec": D_vec, "w_out": w_out}


def _max_rel_err(a, b):
    return float(jnp.max(jnp.abs(a.astype(jnp.float32) - b)) /
                 (jnp.max(jnp.abs(b)) + 1e-6))


if __name__ == "__main__":
    B, L, d_model = 2, 8, 32
    d_state, d_conv, expand = 16, 4, 2

    key = jax.random.PRNGKey(0)
    k_x, k_p = jax.random.split(key)
    x = jax.random.normal(k_x, (B, L, d_model), jnp.float32)
    params = init_params(k_p, d_model, d_state, d_conv, expand)

    ref = reference_forward(x, params)

    # Exact-math path: f32 MXU inputs, auto block_b (keeps grid >= 2).
    out_f32 = jax.block_until_ready(
        simplified_mamba(x, params, compute_dtype=jnp.float32))
    assert out_f32.shape == (B, L, d_model)
    assert _max_rel_err(out_f32, ref) < 1e-4, "f32 kernel mismatch vs reference"

    # Fast path: bf16 MXU inputs / activation slab, whole batch in one step.
    out_bf16 = jax.block_until_ready(
        simplified_mamba(x, params, compute_dtype=jnp.bfloat16, block_b=2))
    assert out_bf16.shape == (B, L, d_model)
    assert _max_rel_err(out_bf16, ref) < 8e-2, "bf16 kernel mismatch vs reference"

    print("KERNEL_OK")
</pallas_src>

<mosaic_0001>
module attributes {stable_mosaic.version = 11 : i64} {
  func.func @_mamba_kernel(%arg0: i32, %arg1: memref<8x32xf32, #tpu.memory_space<vmem>>, %arg2: memref<32x64xf32, #tpu.memory_space<vmem>>, %arg3: memref<32x64xf32, #tpu.memory_space<vmem>>, %arg4: memref<4x64xf32, #tpu.memory_space<vmem>>, %arg5: memref<1x64xf32, #tpu.memory_space<vmem>>, %arg6: memref<64x16xf32, #tpu.memory_space<vmem>>, %arg7: memref<64x16xf32, #tpu.memory_space<vmem>>, %arg8: memref<64x16xf32, #tpu.memory_space<vmem>>, %arg9: memref<16x64xf32, #tpu.memory_space<vmem>>, %arg10: memref<1x64xf32, #tpu.memory_space<vmem>>, %arg11: memref<64x32xf32, #tpu.memory_space<vmem>>, %arg12: memref<8x32xf32, #tpu.memory_space<vmem>>) attributes {dimension_semantics = [#tpu.dimension_semantics<parallel>], iteration_bounds = array<i64: 2>, scalar_prefetch = 0 : i64, scratch_operands = 0 : i64, tpu.core_type = #tpu.core_type<tc>, window_params = [{transform_indices = @transform_0, window_bounds = array<i64: 8, 32>}, {pipeline_mode = #tpu.pipeline_mode<synchronous>, transform_indices = @transform_1, window_bounds = array<i64: 32, 64>}, {pipeline_mode = #tpu.pipeline_mode<synchronous>, transform_indices = @transform_2, window_bounds = array<i64: 32, 64>}, {pipeline_mode = #tpu.pipeline_mode<synchronous>, transform_indices = @transform_3, window_bounds = array<i64: 4, 64>}, {pipeline_mode = #tpu.pipeline_mode<synchronous>, transform_indices = @transform_4, window_bounds = array<i64: 1, 64>}, {pipeline_mode = #tpu.pipeline_mode<synchronous>, transform_indices = @transform_5, window_bounds = array<i64: 64, 16>}, {pipeline_mode = #tpu.pipeline_mode<synchronous>, transform_indices = @transform_6, window_bounds = array<i64: 64, 16>}, {pipeline_mode = #tpu.pipeline_mode<synchronous>, transform_indices = @transform_7, window_bounds = array<i64: 64, 16>}, {pipeline_mode = #tpu.pipeline_mode<synchronous>, transform_indices = @transform_8, window_bounds = array<i64: 16, 64>}, {pipeline_mode = #tpu.pipeline_mode<synchronous>, transform_indices = @transform_9, window_bounds = array<i64: 1, 64>}, {pipeline_mode = #tpu.pipeline_mode<synchronous>, transform_indices = @transform_10, window_bounds = array<i64: 64, 32>}, {transform_indices = @transform_11, window_bounds = array<i64: 8, 32>}]} {
    %c0 = arith.constant 0 : index
    %c0_0 = arith.constant 0 : index
    %0 = vector.load %arg1[%c0, %c0_0] : memref<8x32xf32, #tpu.memory_space<vmem>>, vector<8x32xf32>
    %c0_1 = arith.constant 0 : index
    %c0_2 = arith.constant 0 : index
    %1 = vector.load %arg2[%c0_1, %c0_2] : memref<32x64xf32, #tpu.memory_space<vmem>>, vector<32x64xf32>
    %cst = arith.constant dense<0.000000e+00> : vector<8x64xf32>
    %2 = tpu.matmul %0, %1, %cst {dimension_numbers = #tpu.dot_dimension_numbers<[1], [0], [0], [1], [0, 0, 1, 1], [], []>} : vector<8x32xf32>, vector<32x64xf32>, vector<8x64xf32> -> vector<8x64xf32>
    %c0_3 = arith.constant 0 : index
    %c0_4 = arith.constant 0 : index
    %3 = vector.load %arg3[%c0_3, %c0_4] : memref<32x64xf32, #tpu.memory_space<vmem>>, vector<32x64xf32>
    %cst_5 = arith.constant dense<0.000000e+00> : vector<8x64xf32>
    %4 = tpu.matmul %0, %3, %cst_5 {dimension_numbers = #tpu.dot_dimension_numbers<[1], [0], [0], [1], [0, 0, 1, 1], [], []>} : vector<8x32xf32>, vector<32x64xf32>, vector<8x64xf32> -> vector<8x64xf32>
    %c0_6 = arith.constant 0 : index
    %c0_7 = arith.constant 0 : index
    %5 = vector.load %arg4[%c0_6, %c0_7] : memref<4x64xf32, #tpu.memory_space<vmem>>, vector<4x64xf32>
    %6 = vector.extract_strided_slice %5 {offsets = [3, 0], sizes = [1, 64], strides = [1, 1]} : vector<4x64xf32> to vector<1x64xf32>
    %7 = vector.broadcast %6 : vector<1x64xf32> to vector<8x64xf32>
    %8 = arith.mulf %2, %7 : vector<8x64xf32>
    %9 = tpu.iota {dimensions = array<i32: 0>} : vector<8x1xi32>
    %c7_i32 = arith.constant 7 : i32
    %10 = vector.broadcast %c7_i32 : i32 to vector<8x1xi32>
    %11 = arith.andi %9, %10 : vector<8x1xi32>
    %c1_i32 = arith.constant 1 : i32
    %12 = tpu.dynamic_rotate %2 by %c1_i32 dim 0 : vector<8x64xf32>, i32 -> vector<8x64xf32>
    %c1_i32_8 = arith.constant 1 : i32
    %13 = vector.broadcast %c1_i32_8 : i32 to vector<8x1xi32>
    %14 = arith.cmpi slt, %11, %13 : vector<8x1xi32>
    %cst_9 = arith.constant 0.000000e+00 : f32
    %15 = vector.shape_cast %14 : vector<8x1xi1> to vector<8x1xi1>
    %16 = vector.broadcast %15 : vector<8x1xi1> to vector<8x64xi1>
    %17 = vector.broadcast %cst_9 : f32 to vector<8x64xf32>
    %18 = arith.select %16, %17, %12 : vector<8x64xi1>, vector<8x64xf32>
    %19 = vector.extract_strided_slice %5 {offsets = [2, 0], sizes = [1, 64], strides = [1, 1]} : vector<4x64xf32> to vector<1x64xf32>
    %20 = vector.broadcast %19 : vector<1x64xf32> to vector<8x64xf32>
    %21 = arith.mulf %20, %18 : vector<8x64xf32>
    %22 = arith.addf %8, %21 : vector<8x64xf32>
    %c2_i32 = arith.constant 2 : i32
    %23 = tpu.dynamic_rotate %2 by %c2_i32 dim 0 : vector<8x64xf32>, i32 -> vector<8x64xf32>
    %c2_i32_10 = arith.constant 2 : i32
    %24 = vector.broadcast %c2_i32_10 : i32 to vector<8x1xi32>
    %25 = arith.cmpi slt, %11, %24 : vector<8x1xi32>
    %cst_11 = arith.constant 0.000000e+00 : f32
    %26 = vector.shape_cast %25 : vector<8x1xi1> to vector<8x1xi1>
    %27 = vector.broadcast %26 : vector<8x1xi1> to vector<8x64xi1>
    %28 = vector.broadcast %cst_11 : f32 to vector<8x64xf32>
    %29 = arith.select %27, %28, %23 : vector<8x64xi1>, vector<8x64xf32>
    %30 = vector.extract_strided_slice %5 {offsets = [1, 0], sizes = [1, 64], strides = [1, 1]} : vector<4x64xf32> to vector<1x64xf32>
    %31 = vector.broadcast %30 : vector<1x64xf32> to vector<8x64xf32>
    %32 = arith.mulf %31, %29 : vector<8x64xf32>
    %33 = arith.addf %22, %32 : vector<8x64xf32>
    %c3_i32 = arith.constant 3 : i32
    %34 = tpu.dynamic_rotate %2 by %c3_i32 dim 0 : vector<8x64xf32>, i32 -> vector<8x64xf32>
    %c3_i32_12 = arith.constant 3 : i32
    %35 = vector.broadcast %c3_i32_12 : i32 to vector<8x1xi32>
    %36 = arith.cmpi slt, %11, %35 : vector<8x1xi32>
    %cst_13 = arith.constant 0.000000e+00 : f32
    %37 = vector.shape_cast %36 : vector<8x1xi1> to vector<8x1xi1>
    %38 = vector.broadcast %37 : vector<8x1xi1> to vector<8x64xi1>
    %39 = vector.broadcast %cst_13 : f32 to vector<8x64xf32>
    %40 = arith.select %38, %39, %34 : vector<8x64xi1>, vector<8x64xf32>
    %41 = vector.extract_strided_slice %5 {offsets = [0, 0], sizes = [1, 64], strides = [1, 1]} : vector<4x64xf32> to vector<1x64xf32>
    %42 = vector.broadcast %41 : vector<1x64xf32> to vector<8x64xf32>
    %43 = arith.mulf %42, %40 : vector<8x64xf32>
    %44 = arith.addf %33, %43 : vector<8x64xf32>
    %c0_14 = arith.constant 0 : index
    %c0_15 = arith.constant 0 : index
    %45 = vector.load %arg5[%c0_14, %c0_15] : memref<1x64xf32, #tpu.memory_space<vmem>>, vector<1x64xf32>
    %46 = vector.broadcast %45 : vector<1x64xf32> to vector<8x64xf32>
    %47 = arith.addf %44, %46 : vector<8x64xf32>
    %48 = arith.negf %47 : vector<8x64xf32>
    %49 = math.exp %48 : vector<8x64xf32>
    %cst_16 = arith.constant 1.000000e+00 : f32
    %50 = vector.broadcast %cst_16 : f32 to vector<8x64xf32>
    %51 = arith.addf %50, %49 : vector<8x64xf32>
    %52 = arith.divf %50, %51 : vector<8x64xf32>
    %53 = arith.mulf %47, %52 : vector<8x64xf32>
    %c0_17 = arith.constant 0 : index
    %c0_18 = arith.constant 0 : index
    %54 = vector.load %arg6[%c0_17, %c0_18] : memref<64x16xf32, #tpu.memory_space<vmem>>, vector<64x16xf32>
    %cst_19 = arith.constant dense<0.000000e+00> : vector<8x16xf32>
    %55 = tpu.matmul %53, %54, %cst_19 {dimension_numbers = #tpu.dot_dimension_numbers<[1], [0], [0], [1], [0, 0, 1, 1], [], []>} : vector<8x64xf32>, vector<64x16xf32>, vector<8x16xf32> -> vector<8x16xf32>
    %c0_20 = arith.constant 0 : index
    %c0_21 = arith.constant 0 : index
    %56 = vector.load %arg7[%c0_20, %c0_21] : memref<64x16xf32, #tpu.memory_space<vmem>>, vector<64x16xf32>
    %cst_22 = arith.constant dense<0.000000e+00> : vector<8x16xf32>
    %57 = tpu.matmul %53, %56, %cst_22 {dimension_numbers = #tpu.dot_dimension_numbers<[1], [0], [0], [1], [0, 0, 1, 1], [], []>} : vector<8x64xf32>, vector<64x16xf32>, vector<8x16xf32> -> vector<8x16xf32>
    %c0_23 = arith.constant 0 : index
    %c0_24 = arith.constant 0 : index
    %58 = vector.load %arg8[%c0_23, %c0_24] : memref<64x16xf32, #tpu.memory_space<vmem>>, vector<64x16xf32>
    %cst_25 = arith.constant dense<0.000000e+00> : vector<8x16xf32>
    %59 = tpu.matmul %53, %58, %cst_25 {dimension_numbers = #tpu.dot_dimension_numbers<[1], [0], [0], [1], [0, 0, 1, 1], [], []>} : vector<8x64xf32>, vector<64x16xf32>, vector<8x16xf32> -> vector<8x16xf32>
    %60 = vector.shape_cast %59 : vector<8x16xf32> to vector<1x8x16xf32>
    %cst_26 = arith.constant dense<0.000000e+00> : vector<1x16xf32>
    %61 = vector.multi_reduction <add>, %60, %cst_26 [1] : vector<1x8x16xf32> to vector<1x16xf32>
    %62 = vector.shape_cast %61 : vector<1x16xf32> to vector<1x1x16xf32>
    %cst_27 = arith.constant 8.000000e+00 : f32
    %63 = vector.broadcast %cst_27 : f32 to vector<1x1x16xf32>
    %64 = arith.divf %62, %63 : vector<1x1x16xf32>
    %65 = arith.mulf %55, %57 : vector<8x16xf32>
    %66 = vector.shape_cast %65 : vector<8x16xf32> to vector<1x8x16xf32>
    %67 = vector.broadcast %64 : vector<1x1x16xf32> to vector<1x8x16xf32>
    %68 = arith.mulf %67, %66 : vector<1x8x16xf32>
    %69 = vector.shape_cast %68 : vector<1x8x16xf32> to vector<8x16xf32>
    %c0_28 = arith.constant 0 : index
    %c0_29 = arith.constant 0 : index
    %70 = vector.load %arg9[%c0_28, %c0_29] : memref<16x64xf32, #tpu.memory_space<vmem>>, vector<16x64xf32>
    %cst_30 = arith.constant dense<0.000000e+00> : vector<8x64xf32>
    %71 = tpu.matmul %69, %70, %cst_30 {dimension_numbers = #tpu.dot_dimension_numbers<[1], [0], [0], [1], [0, 0, 1, 1], [], []>} : vector<8x16xf32>, vector<16x64xf32>, vector<8x64xf32> -> vector<8x64xf32>
    %c0_31 = arith.constant 0 : index
    %c0_32 = arith.constant 0 : index
    %72 = vector.load %arg10[%c0_31, %c0_32] : memref<1x64xf32, #tpu.memory_space<vmem>>, vector<1x64xf32>
    %73 = vector.broadcast %72 : vector<1x64xf32> to vector<8x64xf32>
    %74 = arith.mulf %53, %73 : vector<8x64xf32>
    %75 = arith.addf %71, %74 : vector<8x64xf32>
    %76 = arith.negf %4 : vector<8x64xf32>
    %77 = math.exp %76 : vector<8x64xf32>
    %cst_33 = arith.constant 1.000000e+00 : f32
    %78 = vector.broadcast %cst_33 : f32 to vector<8x64xf32>
    %79 = arith.addf %78, %77 : vector<8x64xf32>
    %80 = arith.divf %78, %79 : vector<8x64xf32>
    %81 = arith.mulf %4, %80 : vector<8x64xf32>
    %82 = arith.mulf %75, %81 : vector<8x64xf32>
    %c0_34 = arith.constant 0 : index
    %c0_35 = arith.constant 0 : index
    %83 = vector.load %arg11[%c0_34, %c0_35] : memref<64x32xf32, #tpu.memory_space<vmem>>, vector<64x32xf32>
    %cst_36 = arith.constant dense<0.000000e+00> : vector<8x32xf32>
    %84 = tpu.matmul %82, %83, %cst_36 {dimension_numbers = #tpu.dot_dimension_numbers<[1], [0], [0], [1], [0, 0, 1, 1], [], []>} : vector<8x64xf32>, vector<64x32xf32>, vector<8x32xf32> -> vector<8x32xf32>
    %c0_37 = arith.constant 0 : index
    %c0_38 = arith.constant 0 : index
    %85 = vector.load %arg12[%c0_37, %c0_38] : memref<8x32xf32, #tpu.memory_space<vmem>>, vector<8x32xf32>
    tpu.vector_store %arg12[%c0_37, %c0_38], %84 {strides = array<i32>} : memref<8x32xf32, #tpu.memory_space<vmem>>, vector<8x32xf32>,
    return
  }
  func.func @transform_0(%arg0: i32) -> (i32, i32) {
    %c0_i32 = arith.constant 0 : i32
    %c0_i32_0 = arith.constant 0 : i32
    return %arg0, %c0_i32 : i32, i32
  }
  func.func @transform_1(%arg0: i32) -> (i32, i32) {
    %c0_i32 = arith.constant 0 : i32
    %c0_i32_0 = arith.constant 0 : i32
    %c0_i32_1 = arith.constant 0 : i32
    return %c0_i32, %c0_i32_0 : i32, i32
  }
  func.func @transform_2(%arg0: i32) -> (i32, i32) {
    %c0_i32 = arith.constant 0 : i32
    %c0_i32_0 = arith.constant 0 : i32
    %c0_i32_1 = arith.constant 0 : i32
    return %c0_i32, %c0_i32_0 : i32, i32
  }
  func.func @transform_3(%arg0: i32) -> (i32, i32) {
    %c0_i32 = arith.constant 0 : i32
    %c0_i32_0 = arith.constant 0 : i32
    %c0_i32_1 = arith.constant 0 : i32
    return %c0_i32, %c0_i32_0 : i32, i32
  }
  func.func @transform_4(%arg0: i32) -> (i32, i32) {
    %c0_i32 = arith.constant 0 : i32
    %c0_i32_0 = arith.constant 0 : i32
    %c0_i32_1 = arith.constant 0 : i32
    return %c0_i32, %c0_i32_0 : i32, i32
  }
  func.func @transform_5(%arg0: i32) -> (i32, i32) {
    %c0_i32 = arith.constant 0 : i32
    %c0_i32_0 = arith.constant 0 : i32
    %c0_i32_1 = arith.constant 0 : i32
    return %c0_i32, %c0_i32_0 : i32, i32
  }
  func.func @transform_6(%arg0: i32) -> (i32, i32) {
    %c0_i32 = arith.constant 0 : i32
    %c0_i32_0 = arith.constant 0 : i32
    %c0_i32_1 = arith.constant 0 : i32
    return %c0_i32, %c0_i32_0 : i32, i32
  }
  func.func @transform_7(%arg0: i32) -> (i32, i32) {
    %c0_i32 = arith.constant 0 : i32
    %c0_i32_0 = arith.constant 0 : i32
    %c0_i32_1 = arith.constant 0 : i32
    return %c0_i32, %c0_i32_0 : i32, i32
  }
  func.func @transform_8(%arg0: i32) -> (i32, i32) {
    %c0_i32 = arith.constant 0 : i32
    %c0_i32_0 = arith.constant 0 : i32
    %c0_i32_1 = arith.constant 0 : i32
    return %c0_i32, %c0_i32_0 : i32, i32
  }
  func.func @transform_9(%arg0: i32) -> (i32, i32) {
    %c0_i32 = arith.constant 0 : i32
    %c0_i32_0 = arith.constant 0 : i32
    %c0_i32_1 = arith.constant 0 : i32
    return %c0_i32, %c0_i32_0 : i32, i32
  }
  func.func @transform_10(%arg0: i32) -> (i32, i32) {
    %c0_i32 = arith.constant 0 : i32
    %c0_i32_0 = arith.constant 0 : i32
    %c0_i32_1 = arith.constant 0 : i32
    return %c0_i32, %c0_i32_0 : i32, i32
  }
  func.func @transform_11(%arg0: i32) -> (i32, i32) {
    %c0_i32 = arith.constant 0 : i32
    %c0_i32_0 = arith.constant 0 : i32
    return %arg0, %c0_i32 : i32, i32
  }
}

module attributes {stable_mosaic.version = 11 : i64} {
  func.func @_mamba_kernel(%arg0: i32, %arg1: memref<8x32xf32, #tpu.memory_space<vmem>>, %arg2: memref<32x64xf32, #tpu.memory_space<vmem>>, %arg3: memref<32x64xf32, #tpu.memory_space<vmem>>, %arg4: memref<4x64xf32, #tpu.memory_space<vmem>>, %arg5: memref<1x64xf32, #tpu.memory_space<vmem>>, %arg6: memref<64x16xf32, #tpu.memory_space<vmem>>, %arg7: memref<64x16xf32, #tpu.memory_space<vmem>>, %arg8: memref<64x16xf32, #tpu.memory_space<vmem>>, %arg9: memref<16x64xf32, #tpu.memory_space<vmem>>, %arg10: memref<1x64xf32, #tpu.memory_space<vmem>>, %arg11: memref<64x32xf32, #tpu.memory_space<vmem>>, %arg12: memref<8x32xf32, #tpu.memory_space<vmem>>) attributes {dimension_semantics = [#tpu.dimension_semantics<parallel>], iteration_bounds = array<i64: 2>, scalar_prefetch = 0 : i64, scratch_operands = 0 : i64, tpu.core_type = #tpu.core_type<tc>, window_params = [{transform_indices = @transform_0, window_bounds = array<i64: 8, 32>}, {pipeline_mode = #tpu.pipeline_mode<synchronous>, transform_indices = @transform_1, window_bounds = array<i64: 32, 64>}, {pipeline_mode = #tpu.pipeline_mode<synchronous>, transform_indices = @transform_2, window_bounds = array<i64: 32, 64>}, {pipeline_mode = #tpu.pipeline_mode<synchronous>, transform_indices = @transform_3, window_bounds = array<i64: 4, 64>}, {pipeline_mode = #tpu.pipeline_mode<synchronous>, transform_indices = @transform_4, window_bounds = array<i64: 1, 64>}, {pipeline_mode = #tpu.pipeline_mode<synchronous>, transform_indices = @transform_5, window_bounds = array<i64: 64, 16>}, {pipeline_mode = #tpu.pipeline_mode<synchronous>, transform_indices = @transform_6, window_bounds = array<i64: 64, 16>}, {pipeline_mode = #tpu.pipeline_mode<synchronous>, transform_indices = @transform_7, window_bounds = array<i64: 64, 16>}, {pipeline_mode = #tpu.pipeline_mode<synchronous>, transform_indices = @transform_8, window_bounds = array<i64: 16, 64>}, {pipeline_mode = #tpu.pipeline_mode<synchronous>, transform_indices = @transform_9, window_bounds = array<i64: 1, 64>}, {pipeline_mode = #tpu.pipeline_mode<synchronous>, transform_indices = @transform_10, window_bounds = array<i64: 64, 32>}, {transform_indices = @transform_11, window_bounds = array<i64: 8, 32>}]} {
    %c0 = arith.constant 0 : index
    %c0_0 = arith.constant 0 : index
    %0 = vector.load %arg1[%c0, %c0_0] : memref<8x32xf32, #tpu.memory_space<vmem>>, vector<8x32xf32>
    %c0_1 = arith.constant 0 : index
    %c0_2 = arith.constant 0 : index
    %1 = vector.load %arg2[%c0_1, %c0_2] : memref<32x64xf32, #tpu.memory_space<vmem>>, vector<32x64xf32>
    %cst = arith.constant dense<0.000000e+00> : vector<8x64xf32>
    %2 = tpu.matmul %0, %1, %cst {dimension_numbers = #tpu.dot_dimension_numbers<[1], [0], [0], [1], [0, 0, 1, 1], [], []>} : vector<8x32xf32>, vector<32x64xf32>, vector<8x64xf32> -> vector<8x64xf32>
    %c0_3 = arith.constant 0 : index
    %c0_4 = arith.constant 0 : index
    %3 = vector.load %arg3[%c0_3, %c0_4] : memref<32x64xf32, #tpu.memory_space<vmem>>, vector<32x64xf32>
    %cst_5 = arith.constant dense<0.000000e+00> : vector<8x64xf32>
    %4 = tpu.matmul %0, %3, %cst_5 {dimension_numbers = #tpu.dot_dimension_numbers<[1], [0], [0], [1], [0, 0, 1, 1], [], []>} : vector<8x32xf32>, vector<32x64xf32>, vector<8x64xf32> -> vector<8x64xf32>
    %c0_6 = arith.constant 0 : index
    %c0_7 = arith.constant 0 : index
    %5 = vector.load %arg4[%c0_6, %c0_7] : memref<4x64xf32, #tpu.memory_space<vmem>>, vector<4x64xf32>
    %6 = vector.extract_strided_slice %5 {offsets = [3, 0], sizes = [1, 64], strides = [1, 1]} : vector<4x64xf32> to vector<1x64xf32>
    %7 = vector.broadcast %6 : vector<1x64xf32> to vector<8x64xf32>
    %8 = arith.mulf %2, %7 : vector<8x64xf32>
    %9 = tpu.iota {dimensions = array<i32: 0>} : vector<8x1xi32>
    %c7_i32 = arith.constant 7 : i32
    %10 = vector.broadcast %c7_i32 : i32 to vector<8x1xi32>
    %11 = arith.andi %9, %10 : vector<8x1xi32>
    %c1_i32 = arith.constant 1 : i32
    %12 = tpu.dynamic_rotate %2 by %c1_i32 dim 0 : vector<8x64xf32>, i32 -> vector<8x64xf32>
    %c1_i32_8 = arith.constant 1 : i32
    %13 = vector.broadcast %c1_i32_8 : i32 to vector<8x1xi32>
    %14 = arith.cmpi slt, %11, %13 : vector<8x1xi32>
    %cst_9 = arith.constant 0.000000e+00 : f32
    %15 = vector.shape_cast %14 : vector<8x1xi1> to vector<8x1xi1>
    %16 = vector.broadcast %15 : vector<8x1xi1> to vector<8x64xi1>
    %17 = vector.broadcast %cst_9 : f32 to vector<8x64xf32>
    %18 = arith.select %16, %17, %12 : vector<8x64xi1>, vector<8x64xf32>
    %19 = vector.extract_strided_slice %5 {offsets = [2, 0], sizes = [1, 64], strides = [1, 1]} : vector<4x64xf32> to vector<1x64xf32>
    %20 = vector.broadcast %19 : vector<1x64xf32> to vector<8x64xf32>
    %21 = arith.mulf %20, %18 : vector<8x64xf32>
    %22 = arith.addf %8, %21 : vector<8x64xf32>
    %c2_i32 = arith.constant 2 : i32
    %23 = tpu.dynamic_rotate %2 by %c2_i32 dim 0 : vector<8x64xf32>, i32 -> vector<8x64xf32>
    %c2_i32_10 = arith.constant 2 : i32
    %24 = vector.broadcast %c2_i32_10 : i32 to vector<8x1xi32>
    %25 = arith.cmpi slt, %11, %24 : vector<8x1xi32>
    %cst_11 = arith.constant 0.000000e+00 : f32
    %26 = vector.shape_cast %25 : vector<8x1xi1> to vector<8x1xi1>
    %27 = vector.broadcast %26 : vector<8x1xi1> to vector<8x64xi1>
    %28 = vector.broadcast %cst_11 : f32 to vector<8x64xf32>
    %29 = arith.select %27, %28, %23 : vector<8x64xi1>, vector<8x64xf32>
    %30 = vector.extract_strided_slice %5 {offsets = [1, 0], sizes = [1, 64], strides = [1, 1]} : vector<4x64xf32> to vector<1x64xf32>
    %31 = vector.broadcast %30 : vector<1x64xf32> to vector<8x64xf32>
    %32 = arith.mulf %31, %29 : vector<8x64xf32>
    %33 = arith.addf %22, %32 : vector<8x64xf32>
    %c3_i32 = arith.constant 3 : i32
    %34 = tpu.dynamic_rotate %2 by %c3_i32 dim 0 : vector<8x64xf32>, i32 -> vector<8x64xf32>
    %c3_i32_12 = arith.constant 3 : i32
    %35 = vector.broadcast %c3_i32_12 : i32 to vector<8x1xi32>
    %36 = arith.cmpi slt, %11, %35 : vector<8x1xi32>
    %cst_13 = arith.constant 0.000000e+00 : f32
    %37 = vector.shape_cast %36 : vector<8x1xi1> to vector<8x1xi1>
    %38 = vector.broadcast %37 : vector<8x1xi1> to vector<8x64xi1>
    %39 = vector.broadcast %cst_13 : f32 to vector<8x64xf32>
    %40 = arith.select %38, %39, %34 : vector<8x64xi1>, vector<8x64xf32>
    %41 = vector.extract_strided_slice %5 {offsets = [0, 0], sizes = [1, 64], strides = [1, 1]} : vector<4x64xf32> to vector<1x64xf32>
    %42 = vector.broadcast %41 : vector<1x64xf32> to vector<8x64xf32>
    %43 = arith.mulf %42, %40 : vector<8x64xf32>
    %44 = arith.addf %33, %43 : vector<8x64xf32>
    %c0_14 = arith.constant 0 : index
    %c0_15 = arith.constant 0 : index
    %45 = vector.load %arg5[%c0_14, %c0_15] : memref<1x64xf32, #tpu.memory_space<vmem>>, vector<1x64xf32>
    %46 = vector.broadcast %45 : vector<1x64xf32> to vector<8x64xf32>
    %47 = arith.addf %44, %46 : vector<8x64xf32>
    %48 = arith.negf %47 : vector<8x64xf32>
    %49 = math.exp %48 : vector<8x64xf32>
    %cst_16 = arith.constant 1.000000e+00 : f32
    %50 = vector.broadcast %cst_16 : f32 to vector<8x64xf32>
    %51 = arith.addf %50, %49 : vector<8x64xf32>
    %52 = arith.divf %50, %51 : vector<8x64xf32>
    %53 = arith.mulf %47, %52 : vector<8x64xf32>
    %c0_17 = arith.constant 0 : index
    %c0_18 = arith.constant 0 : index
    %54 = vector.load %arg6[%c0_17, %c0_18] : memref<64x16xf32, #tpu.memory_space<vmem>>, vector<64x16xf32>
    %cst_19 = arith.constant dense<0.000000e+00> : vector<8x16xf32>
    %55 = tpu.matmul %53, %54, %cst_19 {dimension_numbers = #tpu.dot_dimension_numbers<[1], [0], [0], [1], [0, 0, 1, 1], [], []>} : vector<8x64xf32>, vector<64x16xf32>, vector<8x16xf32> -> vector<8x16xf32>
    %c0_20 = arith.constant 0 : index
    %c0_21 = arith.constant 0 : index
    %56 = vector.load %arg7[%c0_20, %c0_21] : memref<64x16xf32, #tpu.memory_space<vmem>>, vector<64x16xf32>
    %cst_22 = arith.constant dense<0.000000e+00> : vector<8x16xf32>
    %57 = tpu.matmul %53, %56, %cst_22 {dimension_numbers = #tpu.dot_dimension_numbers<[1], [0], [0], [1], [0, 0, 1, 1], [], []>} : vector<8x64xf32>, vector<64x16xf32>, vector<8x16xf32> -> vector<8x16xf32>
    %c0_23 = arith.constant 0 : index
    %c0_24 = arith.constant 0 : index
    %58 = vector.load %arg8[%c0_23, %c0_24] : memref<64x16xf32, #tpu.memory_space<vmem>>, vector<64x16xf32>
    %cst_25 = arith.constant dense<0.000000e+00> : vector<8x16xf32>
    %59 = tpu.matmul %53, %58, %cst_25 {dimension_numbers = #tpu.dot_dimension_numbers<[1], [0], [0], [1], [0, 0, 1, 1], [], []>} : vector<8x64xf32>, vector<64x16xf32>, vector<8x16xf32> -> vector<8x16xf32>
    %60 = vector.shape_cast %59 : vector<8x16xf32> to vector<1x8x16xf32>
    %cst_26 = arith.constant dense<0.000000e+00> : vector<1x16xf32>
    %61 = vector.multi_reduction <add>, %60, %cst_26 [1] : vector<1x8x16xf32> to vector<1x16xf32>
    %62 = vector.shape_cast %61 : vector<1x16xf32> to vector<1x1x16xf32>
    %cst_27 = arith.constant 8.000000e+00 : f32
    %63 = vector.broadcast %cst_27 : f32 to vector<1x1x16xf32>
    %64 = arith.divf %62, %63 : vector<1x1x16xf32>
    %65 = arith.mulf %55, %57 : vector<8x16xf32>
    %66 = vector.shape_cast %65 : vector<8x16xf32> to vector<1x8x16xf32>
    %67 = vector.broadcast %64 : vector<1x1x16xf32> to vector<1x8x16xf32>
    %68 = arith.mulf %67, %66 : vector<1x8x16xf32>
    %69 = vector.shape_cast %68 : vector<1x8x16xf32> to vector<8x16xf32>
    %c0_28 = arith.constant 0 : index
    %c0_29 = arith.constant 0 : index
    %70 = vector.load %arg9[%c0_28, %c0_29] : memref<16x64xf32, #tpu.memory_space<vmem>>, vector<16x64xf32>
    %cst_30 = arith.constant dense<0.000000e+00> : vector<8x64xf32>
    %71 = tpu.matmul %69, %70, %cst_30 {dimension_numbers = #tpu.dot_dimension_numbers<[1], [0], [0], [1], [0, 0, 1, 1], [], []>} : vector<8x16xf32>, vector<16x64xf32>, vector<8x64xf32> -> vector<8x64xf32>
    %c0_31 = arith.constant 0 : index
    %c0_32 = arith.constant 0 : index
    %72 = vector.load %arg10[%c0_31, %c0_32] : memref<1x64xf32, #tpu.memory_space<vmem>>, vector<1x64xf32>
    %73 = vector.broadcast %72 : vector<1x64xf32> to vector<8x64xf32>
    %74 = arith.mulf %53, %73 : vector<8x64xf32>
    %75 = arith.addf %71, %74 : vector<8x64xf32>
    %76 = arith.negf %4 : vector<8x64xf32>
    %77 = math.exp %76 : vector<8x64xf32>
    %cst_33 = arith.constant 1.000000e+00 : f32
    %78 = vector.broadcast %cst_33 : f32 to vector<8x64xf32>
    %79 = arith.addf %78, %77 : vector<8x64xf32>
    %80 = arith.divf %78, %79 : vector<8x64xf32>
    %81 = arith.mulf %4, %80 : vector<8x64xf32>
    %82 = arith.mulf %75, %81 : vector<8x64xf32>
    %c0_34 = arith.constant 0 : index
    %c0_35 = arith.constant 0 : index
    %83 = vector.load %arg11[%c0_34, %c0_35] : memref<64x32xf32, #tpu.memory_space<vmem>>, vector<64x32xf32>
    %cst_36 = arith.constant dense<0.000000e+00> : vector<8x32xf32>
    %84 = tpu.matmul %82, %83, %cst_36 {dimension_numbers = #tpu.dot_dimension_numbers<[1], [0], [0], [1], [0, 0, 1, 1], [], []>} : vector<8x64xf32>, vector<64x32xf32>, vector<8x32xf32> -> vector<8x32xf32>
    %c0_37 = arith.constant 0 : index
    %c0_38 = arith.constant 0 : index
    %85 = vector.load %arg12[%c0_37, %c0_38] : memref<8x32xf32, #tpu.memory_space<vmem>>, vector<8x32xf32>
    tpu.vector_store %arg12[%c0_37, %c0_38], %84 {strides = array<i32>} : memref<8x32xf32, #tpu.memory_space<vmem>>, vector<8x32xf32>,
    return
  }
  func.func @transform_0(%arg0: i32) -> (i32, i32) {
    %c0_i32 = arith.constant 0 : i32
    %c0_i32_0 = arith.constant 0 : i32
    return %arg0, %c0_i32 : i32, i32
  }
  func.func @transform_1(%arg0: i32) -> (i32, i32) {
    %c0_i32 = arith.constant 0 : i32
    %c0_i32_0 = arith.constant 0 : i32
    %c0_i32_1 = arith.constant 0 : i32
    return %c0_i32, %c0_i32_0 : i32, i32
  }
  func.func @transform_2(%arg0: i32) -> (i32, i32) {
    %c0_i32 = arith.constant 0 : i32
    %c0_i32_0 = arith.constant 0 : i32
    %c0_i32_1 = arith.constant 0 : i32
    return %c0_i32, %c0_i32_0 : i32, i32
  }
  func.func @transform_3(%arg0: i32) -> (i32, i32) {
    %c0_i32 = arith.constant 0 : i32
    %c0_i32_0 = arith.constant 0 : i32
    %c0_i32_1 = arith.constant 0 : i32
    return %c0_i32, %c0_i32_0 : i32, i32
  }
  func.func @transform_4(%arg0: i32) -> (i32, i32) {
    %c0_i32 = arith.constant 0 : i32
    %c0_i32_0 = arith.constant 0 : i32
    %c0_i32_1 = arith.constant 0 : i32
    return %c0_i32, %c0_i32_0 : i32, i32
  }
  func.func @transform_5(%arg0: i32) -> (i32, i32) {
    %c0_i32 = arith.constant 0 : i32
    %c0_i32_0 = arith.constant 0 : i32
    %c0_i32_1 = arith.constant 0 : i32
    return %c0_i32, %c0_i32_0 : i32, i32
  }
  func.func @transform_6(%arg0: i32) -> (i32, i32) {
    %c0_i32 = arith.constant 0 : i32
    %c0_i32_0 = arith.constant 0 : i32
    %c0_i32_1 = arith.constant 0 : i32
    return %c0_i32, %c0_i32_0 : i32, i32
  }
  func.func @transform_7(%arg0: i32) -> (i32, i32) {
    %c0_i32 = arith.constant 0 : i32
    %c0_i32_0 = arith.constant 0 : i32
    %c0_i32_1 = arith.constant 0 : i32
    return %c0_i32, %c0_i32_0 : i32, i32
  }
  func.func @transform_8(%arg0: i32) -> (i32, i32) {
    %c0_i32 = arith.constant 0 : i32
    %c0_i32_0 = arith.constant 0 : i32
    %c0_i32_1 = arith.constant 0 : i32
    return %c0_i32, %c0_i32_0 : i32, i32
  }
  func.func @transform_9(%arg0: i32) -> (i32, i32) {
    %c0_i32 = arith.constant 0 : i32
    %c0_i32_0 = arith.constant 0 : i32
    %c0_i32_1 = arith.constant 0 : i32
    return %c0_i32, %c0_i32_0 : i32, i32
  }
  func.func @transform_10(%arg0: i32) -> (i32, i32) {
    %c0_i32 = arith.constant 0 : i32
    %c0_i32_0 = arith.constant 0 : i32
    %c0_i32_1 = arith.constant 0 : i32
    return %c0_i32, %c0_i32_0 : i32, i32
  }
  func.func @transform_11(%arg0: i32) -> (i32, i32) {
    %c0_i32 = arith.constant 0 : i32
    %c0_i32_0 = arith.constant 0 : i32
    return %arg0, %c0_i32 : i32, i32
  }
}

</mosaic_0001>

<bundles_post_ra>
// kernel: tpu_custom_call.1
= control target key start
LH: loop header
LB: loop body
LE: loop exit
PB: predicated region body
PF: predicated region fallthrough
CT: control target
= control target key end

     0   :  { %16 = vsyncpa [#allocation3], 0  ;;  %s1789_s0 = inlined_call_operand.vmem [shape: f32[16,32], index: 0, kind: input, shape index: {}]   ;;  %s1790_s1 = inlined_call_operand.vmem [shape: f32[32,64], index: 1, kind: input, shape index: {}]   ;;  %s1791_s2 = inlined_call_operand.vmem [shape: f32[32,64], index: 2, kind: input, shape index: {}]   ;;  %s1792_s3 = inlined_call_operand.vmem [shape: f32[4,64], index: 3, kind: input, shape index: {}]   ;;  %s1793_s4 = inlined_call_operand.vmem [shape: f32[1,64], index: 4, kind: input, shape index: {}]   ;;  %s1794_s5 = inlined_call_operand.vmem [shape: f32[64,16], index: 5, kind: input, shape index: {}]   ;;  %s1795_s6 = inlined_call_operand.vmem [shape: f32[64,16], index: 6, kind: input, shape index: {}]   ;;  %s1796_s7 = inlined_call_operand.vmem [shape: f32[64,16], index: 7, kind: input, shape index: {}]   ;;  %s1797_s8 = inlined_call_operand.vmem [shape: f32[16,64], index: 8, kind: input, shape index: {}]   ;;  %s1798_s9 = inlined_call_operand.vmem [shape: f32[1,64], index: 9, kind: input, shape index: {}]   ;;  %s1799_s10 = inlined_call_operand.vmem [shape: f32[64,32], index: 10, kind: input, shape index: {}]   ;;  %s1800_s11 = inlined_call_operand.hbm [shape: f32[16,32], index: 11, kind: output, shape index: {}]  }
   0x1   :  { %18 = vsyncpa [#allocation3 + $0x1], 0  ;;  %s1504_s17 = smov 0   ;;  %s1506_s18 = smov 0  }
   0x2   :  { %s1508_s19 = smov 0   ;;  %s1510_s20 = smov 0  }
   0x3 LB: > { %s1525_s21 = sadd.s32 4294967295, %s1438_s20   ;;  %s1088_s22 = sadd.s32 4294967294, %s1438_s20   ;;  %s1438_s20 = sphi %s1510_s20, %s1806_s20   ;;  %s1434_s19 = sphi %s1508_s19, %s1805_s19   ;;  %s1430_s18 = sphi %s1506_s18, %s1804_s18   ;;  %s1426_s17 = sphi %s1504_s17, %s1803_s17  }
   0x4   : > { %s1529_s23 = sadd.s32 1, %s1438_s20   ;;  %s267_s24 = sadd.s32 1, %s1434_s19 }
   0x5   : > { %s264_s25 = ssub.s32 %s1438_s20, %s1529_s23  ;;  %p277_p0 = scmp.ne.s32.totalorder %s1434_s19, %s1430_s18 }
   0x6   : > { %p265_p1 = scmp.eq.s32.totalorder %s264_s25, 0  ;;  %p278_p2 = scmp.eq.s32.totalorder %s1525_s21, 1 }
   0x7   : > { %p283_p3 = scmp.ne.s32.totalorder %s1430_s18, %s1426_s17  ;;  %p284_p4 = scmp.eq.s32.totalorder %s1088_s22, 1 }
   0x8   : > { %s1540_s26 = scalar_select %p265_p1, %s1434_s19, %s267_s24  }
   0x9   : > { %p1542_p5 = por %p278_p2, %p277_p0  ;;  %p1546_p6 = por %p284_p4, %p283_p3 }
   0xa   : > { %p1091_p7 = scmp.ge.s32.totalorder %s1438_s20, 1  ;;  %p339_p8 = scmp.lt.s32.totalorder %s1438_s20, 3 }
   0xc   : > { %p340_p9 = pnand %p1091_p7, %p339_p8 }
   0xd   : > { %v383_v0 = vld [vmem:[%s1790_s1] sm:$0xff] (!%p340_p9)  ;;  %v384_v1 = vld [vmem:[%s1790_s1 + $0x8] sm:$0xff] (!%p340_p9)  ;;  %v385_v2 = vld [vmem:[%s1790_s1 + $0x10] sm:$0xff] (!%p340_p9)  ;;  %v1440_v3 = vmov (!%p340_p9), 0.0|0.0   ;;  %vm1441_vm0 = vmmov (!%p340_p9), 0   ;;  %v1442_v6 = vmov (!%p340_p9), 0.0   ;;  %v536_v39 = vlaneseq (!%p340_p9) }
   0xe   : > { %343 = sbr.rel (%p340_p9) target bundleno = 966 (0x3c6), region = 64  ;;  %1263 = vmatprep.subr.bf16.mxu0 (!%p340_p9), %v1440_v3  ;;  %v1264_v4 = vpack.c.bf16 (!%p340_p9), %v384_v1, %v383_v0  ;;  %v386_v5 = vld [vmem:[%s1790_s1 + $0x18] sm:$0xff] (!%p340_p9)  ;;  %1166 = vmatprep.mubr.msk.f32.mxu0 (!%p340_p9), %vm1441_vm0, %v1442_v6  ;;  %p378_p10 = scmp.lt.s32.totalorder (!%p340_p9), %s1525_s21, 1  ;;  %vm387_vm1 = vcmask (!%p340_p9), 261120   ;;  %v461_v9 = vld [vmem:[%s1791_s2] sm:$0xff] (!%p340_p9)  ;;  %v462_v10 = vld [vmem:[%s1791_s2 + $0x8] sm:$0xff] (!%p340_p9) }
   0xf   : > { %1269 = vmatprep.subr.bf16.mxu1 (!%p340_p9), %v1440_v3  ;;  %1177 = vmatprep.mubr.msk.f32.mxu1 (!%p340_p9), %vm1441_vm0, %v1442_v6  ;;  %v1267_v7 = vpack.c.bf16 (!%p340_p9), %v386_v5, %v385_v2  ;;  %v1270_v11 = vpack.c.bf16 (!%p340_p9), %v462_v10, %v461_v9  ;;  %v463_v12 = vld [vmem:[%s1791_s2 + $0x10] sm:$0xff] (!%p340_p9)  ;;  %v464_v13 = vld [vmem:[%s1791_s2 + $0x18] sm:$0xff] (!%p340_p9)  ;;  %v592_v15 = vld [vmem:[%s1794_s5] sm:$0xff] (!%p340_p9)  ;;  %v537_v40 = vshrl.u32 (!%p340_p9), %v536_v39, 7  ;;  %vm600_vm5 = vcmask (!%p340_p9), 523264   ;;  %s375_s15 = sand.u32 (!%p340_p9), 1, %s1430_s18  }
  0x10   : > { %1265 = vmatpush3.bf16.msra.mxu0 (!%p340_p9), %v1264_v4  ;;  %v1273_v14 = vpack.c.bf16 (!%p340_p9), %v464_v13, %v463_v12  ;;  %v593_v16 = vld [vmem:[%s1794_s5 + $0x8] sm:$0xff] (!%p340_p9)  ;;  %v674_v18 = vld [vmem:[%s1795_s6] sm:$0xff] (!%p340_p9)  ;;  %v594_v21 = vld [vmem:[%s1794_s5 + $0x10] sm:$0xff] (!%p340_p9)  ;;  %vm830_vm6 = vcmask (!%p340_p9), 130048   ;;  %s1092_s16 = sshll.u32 (!%p340_p9), %s375_s15, 3  ;;  %s1106_s22 = sshll.u32 (!%p340_p9), %s1525_s21, 7 }
  0x11   : > { %1266 = vmatprep.subr.bf16.mxu0 (!%p340_p9), %v1440_v3  ;;  %1271 = vmatpush3.bf16.msra.mxu1 (!%p340_p9), %v1270_v11  ;;  %v1276_v17 = vpack.c.bf16 (!%p340_p9), %v593_v16, %v592_v15  ;;  %v675_v19 = vld [vmem:[%s1795_s6 + $0x8] sm:$0xff] (!%p340_p9)  ;;  %v595_v22 = vld [vmem:[%s1794_s5 + $0x18] sm:$0xff] (!%p340_p9)  ;;  %v676_v24 = vld [vmem:[%s1795_s6 + $0x10] sm:$0xff] (!%p340_p9)  ;;  %v538_v41 = vsub.s32 (!%p340_p9), 3, %v537_v40  ;;  %v543_v43 = vand.u32 (!%p340_p9), 7, %v537_v40  ;;  %v551_v44 = vsub.s32 (!%p340_p9), 2, %v537_v40 }
  0x12   : > { %1272 = vmatprep.subr.bf16.mxu1 (!%p340_p9), %v1440_v3  ;;  %v1288_v20 = vpack.c.bf16 (!%p340_p9), %v675_v19, %v674_v18  ;;  %v1279_v23 = vpack.c.bf16 (!%p340_p9), %v595_v22, %v594_v21  ;;  %v677_v25 = vld [vmem:[%s1795_s6 + $0x18] sm:$0xff] (!%p340_p9)  ;;  %v596_v27 = vld [vmem:[%s1794_s5 + $0x20] sm:$0xff] (!%p340_p9)  ;;  %v597_v28 = vld [vmem:[%s1794_s5 + $0x28] sm:$0xff] (!%p340_p9)  ;;  %v562_v45 = vsub.s32 (!%p340_p9), 1, %v537_v40  ;;  %v573_v49 = vsub.s32 (!%p340_p9), 0, %v537_v40  ;;  %s1016_s13 = scalar_lea.sflag (!%p340_p9), [#allocation3], %s375_s15 }
  0x13   : > { %v1291_v26 = vpack.c.bf16 (!%p340_p9), %v677_v25, %v676_v24  ;;  %v678_v29 = vld [vmem:[%s1795_s6 + $0x20] sm:$0xff] (!%p340_p9)  ;;  %v1282_v30 = vpack.c.bf16 (!%p340_p9), %v597_v28, %v596_v27  ;;  %v679_v31 = vld [vmem:[%s1795_s6 + $0x28] sm:$0xff] (!%p340_p9)  ;;  %v598_v33 = vld [vmem:[%s1794_s5 + $0x30] sm:$0xff] (!%p340_p9)  ;;  %vm545_vm2 = vcmp.lt.s32.totalorder (!%p340_p9), %v543_v43, 1  ;;  %vm556_vm3 = vcmp.lt.s32.totalorder (!%p340_p9), %v543_v43, 2 }
  0x14   : > { %1268 = vmatpush3.bf16.msra.mxu0 (!%p340_p9), %v1267_v7  ;;  %v1294_v32 = vpack.c.bf16 (!%p340_p9), %v679_v31, %v678_v29  ;;  %v599_v34 = vld [vmem:[%s1794_s5 + $0x38] sm:$0xff] (!%p340_p9)  ;;  %v680_v35 = vld [vmem:[%s1795_s6 + $0x30] sm:$0xff] (!%p340_p9)  ;;  %v535_v42 = vld [vmem:[%s1792_s3] sm:$0xf] (!%p340_p9)  ;;  %vm567_vm4 = vcmp.lt.s32.totalorder (!%p340_p9), %v543_v43, 3 }
  0x15   : > { %s379_s24 = scalar_select %p378_p10, %s1525_s21, 1  ;;  %1275 = vmatprep.subr.bf16.mxu0 %v1440_v3  ;;  %1274 = vmatpush3.bf16.msra.mxu1 %v1273_v14  ;;  %v681_v36 = vld [vmem:[%s1795_s6 + $0x38] sm:$0xff]  ;;  %v1285_v37 = vpack.c.bf16 %v599_v34, %v598_v33  ;;  %v539_v46 = vrot.slane %v535_v42, %v538_v41  ;;  %v552_v48 = vrot.slane %v535_v42, %v551_v44  ;;  %v1096_v1 = vld [vmem:[%s1793_s4] ss:$0 sm:$0xff]  ;;  %v753_v10 = vld [vmem:[%s1796_s7 + $0x8] sm:$0xff] }
  0x16   : > { %1287 = vmatprep.subr.bf16.mxu1 %v1440_v3  ;;  %v1297_v38 = vpack.c.bf16 %v681_v36, %v680_v35  ;;  %v563_v54 = vrot.slane %v535_v42, %v562_v45  ;;  %v574_v59 = vrot.slane %v535_v42, %v573_v49  ;;  %v752_v9 = vld [vmem:[%s1796_s7] sm:$0xff]  ;;  %v754_v14 = vld [vmem:[%s1796_s7 + $0x10] sm:$0xff]  ;;  %v755_v15 = vld [vmem:[%s1796_s7 + $0x18] sm:$0xff]  ;;  %s1443_s21 = smov [#allocation2]  }
  0x17   : > { %s1093_s25 = sshll.u32 %s379_s24, 3  ;;  %v1300_v12 = vpack.c.bf16 %v753_v10, %v752_v9  ;;  %v1303_v16 = vpack.c.bf16 %v755_v15, %v754_v14  ;;  %v757_v18 = vld [vmem:[%s1796_s7 + $0x28] sm:$0xff]  ;;  %v759_v21 = vld [vmem:[%s1796_s7 + $0x38] sm:$0xff]  ;;  %v842_v25 = vld [vmem:[%s1797_s8] sm:$0xff]  ;;  %s377_s24 = scalar_lea.vmem [#allocation2], %s1092_s16 }
  0x18   : > { %s381_s12 = scalar_lea.vmem %s1789_s0, %s1093_s25  ;;  %v933_v42 = vld [vmem:[%s1799_s10] sm:$0xff]  ;;  %v934_v43 = vld [vmem:[%s1799_s10 + $0x8] sm:$0xff]  ;;  %s1029_s25 = sshll.u32 %s377_s24, 4  ;;  %s1748_s25 = int_to_ptr.vmem [resolvable:$true] %s1029_s25 }
  0x19   : > { %v382_v8 = vld [vmem:[%s381_s12] sm:$0xff]  ;;  %v1315_v45 = vpack.c.bf16 %v934_v43, %v933_v42  ;;  %s1746_s12 = scalar_lea.hbm %s1800_s11, %s1106_s22  ;;  %s1376_s14 = scalar_lea.vmem %s1748_s25, 128 }
  0x1a   : > { %1167 = vmatmul.mubr.msk.f32.vlgmr.msra.gmra.mrb[0].mxu0 %vm387_vm1, %v382_v8  ;;  %1178 = vmatmul.mubr.msk.f32.vlgmr.msra.gmra.mrb[0].mxu1 %vm387_vm1, %v382_v8  ;;  %p1377_p11 = scmp.ne.s32.totalorder %s1748_s25, %s1376_s14  ;;  %s1380_s16 = sshll.u32 %s1443_s21, 4  ;;  %s1381_s16 = int_to_ptr.vmem [resolvable:$false] %s1380_s16 }
  0x1b   : > { %1196 = vmatprep.mubr.msk.f32.mxu0 %vm1441_vm0, %v1442_v6  ;;  %1277 = vmatpush3.bf16.msra.mxu0 %v1276_v17  ;;  %v756_v17 = vld [vmem:[%s1796_s7 + $0x20] sm:$0xff]  ;;  %s1382_s22 = scalar_lea.vmem %s1381_s16, 256  ;;  %p1383_p0 = scmp.lt.s32.totalorder %s1748_s25, %s1381_s16 }
  0x1c   : > { %1289 = vmatpush3.bf16.msra.mxu1 %v1288_v20  ;;  %1278 = vmatprep.subr.bf16.mxu0 %v1440_v3  ;;  %v1306_v19 = vpack.c.bf16 %v757_v18, %v756_v17  ;;  %v758_v20 = vld [vmem:[%s1796_s7 + $0x30] sm:$0xff]  ;;  %p1378_p12 = pnand %p1377_p11, %p1542_p5  ;;  %p1384_p1 = scmp.lt.s32.totalorder %s1382_s22, %s1376_s14 }
  0x1d   : > { %1290 = vmatprep.subr.bf16.mxu1 %v1440_v3  ;;  %1215 = vmatprep.mubr.msk.f32.mxu1 %vm1441_vm0, %v1442_v6  ;;  %v1309_v22 = vpack.c.bf16 %v759_v21, %v758_v20 }
  0x1e   : > { %p1379_p13 = pneg %p1378_p12  ;;  %p1385_p2 = por %p1384_p1, %p1383_p0 }
  0x1f   : > { %1280 = vmatpush3.bf16.msra.mxu0 %v1279_v23 }
  0x20   : > { %1292 = vmatpush3.bf16.msra.mxu1 %v1291_v26  ;;  %1281 = vmatprep.subr.bf16.mxu0 %v1440_v3  ;;  %v843_v26 = vld [vmem:[%s1797_s8 + $0x8] sm:$0xff]  ;;  %p1386_p3 = pnand %p1385_p2, %p1379_p13 }
  0x21   : > { %1293 = vmatprep.subr.bf16.mxu1 %v1440_v3  ;;  %v1312_v27 = vpack.c.bf16 %v843_v26, %v842_v25 }
  0x23   : > { %1283 = vmatpush3.bf16.msra.mxu0 %v1282_v30 }
  0x24   : > { %1295 = vmatpush3.bf16.msra.mxu1 %v1294_v32  ;;  %1284 = vmatprep.subr.bf16.mxu0 %v1440_v3 }
  0x25   : > { %1296 = vmatprep.subr.bf16.mxu1 %v1440_v3 }
  0x27   : > { %1286 = vmatpush3.bf16.msra.mxu0 %v1285_v37 }
  0x28   : > { %1298 = vmatpush3.bf16.msra.mxu1 %v1297_v38  ;;  %1299 = vmatprep.subr.bf16.mxu0 %v1440_v3 }
  0x29   : > { %1311 = vmatprep.subr.bf16.mxu1 %v1440_v3 }
  0xed   : > { %v457_v47 = vpop.f32.mrb[0].mxu0  ;;  %v531_v23 = vpop.f32.mrb[0].mxu1 }
  0xee   : > { %v544_v50 = vrot.slane %v457_v47, 7  ;;  %v555_v51 = vrot.slane %v457_v47, 6  ;;  %v566_v52 = vrot.slane %v457_v47, 5  ;;  %v1168_v53 = vpop.f32.mrb[1].mxu0  ;;  %v540_v57 = vmul.f32 %v539_v46, %v457_v47  ;;  %v1179_v24 = vpop.f32.mrb[1].mxu1  ;;  %v935_v47 = vld [vmem:[%s1799_s10 + $0x10] sm:$0xff] }
  0xef   : > { %v940_v53 = vld [vmem:[%s1799_s10 + $0x38] sm:$0xff] }
  0xf0   : > { %v548_v55 = vsel %vm545_vm2, 0.0, %v544_v50  ;;  %v559_v56 = vsel %vm556_vm3, 0.0, %v555_v51  ;;  %v570_v60 = vsel %vm567_vm4, 0.0, %v566_v52  ;;  %v937_v50 = vld [vmem:[%s1799_s10 + $0x20] sm:$0xff]  ;;  %v938_v51 = vld [vmem:[%s1799_s10 + $0x28] sm:$0xff] }
  0xf1   : > { %v553_v58 = vmul.f32 %v552_v48, %v548_v55  ;;  %v564_v62 = vmul.f32 %v563_v54, %v559_v56  ;;  %v575_v0 = vmul.f32 %v574_v59, %v570_v60  ;;  %v936_v48 = vld [vmem:[%s1799_s10 + $0x18] sm:$0xff]  ;;  %v1321_v52 = vpack.c.bf16 %v938_v51, %v937_v50 }
  0xf2   : > { %v1318_v49 = vpack.c.bf16 %v936_v48, %v935_v47  ;;  %v1103_v55 = vmul.f32 -1.442695, %v531_v23 }
  0xf3   : > { %v554_v61 = vadd.f32 %v553_v58, %v540_v57 }
  0xf5   : > { %v565_v63 = vadd.f32 %v564_v62, %v554_v61 }
  0xf7   : > { %v576_v2 = vadd.f32 %v575_v0, %v565_v63 }
  0xf9   : > { %v584_v4 = vadd.f32 %v1096_v1, %v576_v2 }
  0xfb   : > { %v1097_v5 = vmul.f32 -1.442695, %v584_v4 }
  0xfd   : > { %1368 = vpow2.f32 %v1097_v5 }
 0x107   : > { %v1369_v7 = vpop.eup %1368 }
 0x108   : > { %v588_v8 = vadd.f32 1.0, %v1369_v7 }
 0x10a   : > { %1370 = vrcp.f32 %v588_v8 }
 0x10b   : > { %1372 = vpow2.f32 %v1103_v55 }
 0x114   : > { %v1371_v11 = vpop.eup %1370 }
 0x115   : > { %v1665_v13 = vmul.f32 %v1371_v11, %v584_v4  ;;  %v1373_v56 = vpop.eup %1372 }
 0x116   : > { %v928_v57 = vadd.f32 1.0, %v1373_v56 }
 0x117   : > { %1197 = vmatmul.mubr.msk.f32.vlgmr.msra.gmra.mrb[2].mxu0 %vm600_vm5, %v1665_v13  ;;  %1216 = vmatmul.mubr.msk.f32.vlgmr.msra.gmra.mrb[2].mxu1 %vm600_vm5, %v1665_v13 }
 0x118   : > { %1301 = vmatpush3.bf16.msra.mxu0 %v1300_v12  ;;  %1234 = vmatprep.mubr.msk.f32.mxu0 %vm1441_vm0, %v1442_v6  ;;  %1374 = vrcp.f32 %v928_v57 }
 0x119   : > { %1302 = vmatprep.subr.bf16.mxu0 %v1440_v3  ;;  %1241 = vmatprep.mubr.msk.f32.mxu1 %vm1441_vm0, %v1442_v6 }
 0x11a   : > { %1313 = vmatpush3.bf16.msra.mxu1 %v1312_v27 }
 0x11b   : > { %1314 = vmatprep.subr.bf16.mxu1 %v1440_v3 }
 0x11c   : > { %1304 = vmatpush3.bf16.msra.mxu0 %v1303_v16 }
 0x11d   : > { %1305 = vmatprep.subr.bf16.mxu0 %v1440_v3 }
 0x120   : > { %1307 = vmatpush3.bf16.msra.mxu0 %v1306_v19 }
 0x121   : > { %1308 = vmatprep.subr.bf16.mxu0 %v1440_v3 }
 0x122   : > { %v1375_v58 = vpop.eup %1374 }
 0x123   : > { %v931_v61 = vmul.f32 %v1375_v58, %v531_v23 }
 0x124   : > { %1310 = vmatpush3.bf16.msra.mxu0 %v1309_v22 }
 0x127   : > { %1235 = vmatmul.mubr.msk.f32.vlgmr.msra.gmra.mrb[4].mxu0 %vm600_vm5, %v1665_v13 }
 0x1ea   : > { %v670_v28 = vpop.f32.mrb[2].mxu0  ;;  %v748_v29 = vpop.f32.mrb[2].mxu1 }
 0x1eb   : > { %v840_v30 = vmul.f32 %v748_v29, %v670_v28  ;;  %v1198_v31 = vpop.f32.mrb[3].mxu0  ;;  %v1217_v32 = vpop.f32.mrb[3].mxu1 }
 0x1fa   : > { %v826_v33 = vpop.f32.mrb[4].mxu0 }
 0x1fb   : > { %v831_v34 = vsel %vm830_vm6, %v826_v33, 0.0  ;;  %v1236_v35 = vpop.f32.mrb[5].mxu0 }
 0x1fc   : > { %v832_v36 = vrot.slane %v831_v34, 4 }
 0x1fe   : > { %v833_v37 = vadd.f32 %v832_v36, %v831_v34 }
 0x200   : > { %v834_v38 = vrot.slane %v833_v37, 2 }
 0x202   : > { %v835_v39 = vadd.f32 %v834_v38, %v833_v37 }
 0x204   : > { %v836_v40 = vrot.slane %v835_v39, 1 }
 0x206   : > { %v837_v41 = vadd.f32 %v836_v40, %v835_v39 }
 0x208   : > { %v839_v44 = vmul.f32 0.125, %v837_v41 }
 0x20a   : > { %v841_v46 = vmul.f32 %v840_v30, %v839_v44 }
 0x20c   : > { %1242 = vmatmul.mubr.msk.f32.vlgmr.msra.gmra.mrb[4].mxu1 %vm830_vm6, %v841_v46 }
 0x20d   : > { %1316 = vmatpush3.bf16.msra.mxu1 %v1315_v45  ;;  %1260 = vmatprep.mubr.msk.f32.mxu1 %vm1441_vm0, %v1442_v6  ;;  %v939_v6 = vld [vmem:[%s1799_s10 + $0x30] sm:$0xff] }
 0x20e   : > { %1317 = vmatprep.subr.bf16.mxu1 %v1440_v3  ;;  %v1324_v54 = vpack.c.bf16 %v940_v53, %v939_v6 }
 0x211   : > { %1319 = vmatpush3.bf16.msra.mxu1 %v1318_v49 }
 0x212   : > { %1320 = vmatprep.subr.bf16.mxu1 %v1440_v3 }
 0x215   : > { %1322 = vmatpush3.bf16.msra.mxu1 %v1321_v52 }
 0x216   : > { %1323 = vmatprep.subr.bf16.mxu1 %v1440_v3  ;;  %v1101_v3 = vld [vmem:[%s1798_s9] ss:$0 sm:$0xff] }
 0x217   : > { %v851_v59 = vmul.f32 %v1101_v3, %v1665_v13 }
 0x219   : > { %1325 = vmatpush3.bf16.msra.mxu1 %v1324_v54 }
 0x2df   : > { %v921_v60 = vpop.f32.mrb[4].mxu1 }
 0x2e0   : > { %v922_v62 = vadd.f32 %v921_v60, %v851_v59  ;;  %v1243_v63 = vpop.f32.mrb[5].mxu1 }
 0x2e2   : > { %v932_v0 = vmul.f32 %v931_v61, %v922_v62 }
 0x2e4   : > { %1261 = vmatmul.mubr.msk.f32.vlgmr.msra.gmra.mrb[6].mxu1 %vm600_vm5, %v932_v0 }
 0x3b7   : > { %v1010_v1 = vpop.f32.mrb[6].mxu1 }
 0x3b8   : > { %1014 = vst.msk [vmem:[%s377_s24] sm:$0xff] %vm387_vm1, %v1010_v1  ;;  %v1262_v2 = vpop.f32.mrb[7].mxu1 }
 0x3b9   : > { %1389 = shalt.err (!%p1386_p3)
}
 0x3ba   : > { %s1390_s15 = scalar_lea.hbm %s1746_s12, 128  ;;  %s1394_s30 = scalar_lea.hbm %s1800_s11, 256 }
 0x3bb   : > { %p1391_p4 = scmp.ne.s32.totalorder %s1746_s12, %s1390_s15  ;;  %p1395_p9 = scmp.lt.u32.totalorder %s1746_s12, %s1800_s11 }
 0x3bc   : > { %p1396_p10 = scmp.lt.u32.totalorder %s1394_s30, %s1390_s15  ;;  %p1398_p12 = scmp.lt.u32.totalorder %s1390_s15, %s1746_s12 }
 0x3bd   : > { %p1392_p7 = pnand %p1391_p4, %p1542_p5 }
 0x3be   : > { %p1397_p11 = por %p1396_p10, %p1395_p9 }
 0x3bf   : > { %p1393_p8 = pneg %p1392_p7 }
 0x3c0   : > { %p1399_p13 = por %p1398_p12, %p1397_p11 }
 0x3c2   : > { %p1400_p0 = pnand %p1399_p13, %p1393_p8 }
 0x3c4   : > { %1403 = shalt.err (!%p1400_p0)
}
 0x3c5   : > { %1326 = dma.vmem_to_hbm [thread:$0]  (%p1542_p5), %s1748_s25, 128, %s1746_s12, %s1016_s13  }
 0x3c6 PF: > { %p1332_p1 = scmp.ge.s32.totalorder %s1438_s20, 2  ;;  %s1041_s14 = sand.u32 1, %s1426_s17  }
 0x3c7   : > { %s1042_s22 = scalar_lea.sflag [#allocation3], %s1041_s14 }
 0x3c8   : > { %p1329_p2 = pnand %p1332_p1, %p1546_p6 }
 0x3ca   : > { %1421 = dma.done.wait (!%p1329_p2), %s1042_s22, 128  }
 0x3cb   : > { %1423 = vsyncadd (!%p1329_p2), %s1042_s22, 4294967168  ;;  %p21_p3 = scmp.ge.s32.totalorder %s1529_s23, 4   ;;  %s1803_s17 = smov %s1430_s18 }
 0x3cc   : > { %s1804_s18 = smov %s1434_s19  ;;  %s1805_s19 = smov %s1540_s26 }
 0x3cd   : > { %s1806_s20 = smov %s1529_s23  ;;  %23 = sbr.rel (!%p21_p3) target bundleno = 3 (0x3), region = 99 }
 0x3d4   :  { %1047 = vsyncpa [#allocation3], 1 }
 0x3d5   :  { %1049 = vsyncpa [#allocation3 + $0x1], 1 }

// kernel: tpu_custom_call.1
= control target key start
LH: loop header
LB: loop body
LE: loop exit
PB: predicated region body
PF: predicated region fallthrough
CT: control target
= control target key end

     0   :  { %16 = vsyncpa [#allocation3], 0  ;;  %s1789_s0 = inlined_call_operand.vmem [shape: f32[16,32], index: 0, kind: input, shape index: {}]   ;;  %s1790_s1 = inlined_call_operand.vmem [shape: f32[32,64], index: 1, kind: input, shape index: {}]   ;;  %s1791_s2 = inlined_call_operand.vmem [shape: f32[32,64], index: 2, kind: input, shape index: {}]   ;;  %s1792_s3 = inlined_call_operand.vmem [shape: f32[4,64], index: 3, kind: input, shape index: {}]   ;;  %s1793_s4 = inlined_call_operand.vmem [shape: f32[1,64], index: 4, kind: input, shape index: {}]   ;;  %s1794_s5 = inlined_call_operand.vmem [shape: f32[64,16], index: 5, kind: input, shape index: {}]   ;;  %s1795_s6 = inlined_call_operand.vmem [shape: f32[64,16], index: 6, kind: input, shape index: {}]   ;;  %s1796_s7 = inlined_call_operand.vmem [shape: f32[64,16], index: 7, kind: input, shape index: {}]   ;;  %s1797_s8 = inlined_call_operand.vmem [shape: f32[16,64], index: 8, kind: input, shape index: {}]   ;;  %s1798_s9 = inlined_call_operand.vmem [shape: f32[1,64], index: 9, kind: input, shape index: {}]   ;;  %s1799_s10 = inlined_call_operand.vmem [shape: f32[64,32], index: 10, kind: input, shape index: {}]   ;;  %s1800_s11 = inlined_call_operand.hbm [shape: f32[16,32], index: 11, kind: output, shape index: {}]  }
   0x1   :  { %18 = vsyncpa [#allocation3 + $0x1], 0  ;;  %s1504_s17 = smov 0   ;;  %s1506_s18 = smov 0  }
   0x2   :  { %s1508_s19 = smov 0   ;;  %s1510_s20 = smov 0  }
   0x3 LB: > { %s1525_s21 = sadd.s32 4294967295, %s1438_s20   ;;  %s1088_s22 = sadd.s32 4294967294, %s1438_s20   ;;  %s1438_s20 = sphi %s1510_s20, %s1806_s20   ;;  %s1434_s19 = sphi %s1508_s19, %s1805_s19   ;;  %s1430_s18 = sphi %s1506_s18, %s1804_s18   ;;  %s1426_s17 = sphi %s1504_s17, %s1803_s17  }
   0x4   : > { %s1529_s23 = sadd.s32 1, %s1438_s20   ;;  %s267_s24 = sadd.s32 1, %s1434_s19 }
   0x5   : > { %s264_s25 = ssub.s32 %s1438_s20, %s1529_s23  ;;  %p277_p0 = scmp.ne.s32.totalorder %s1434_s19, %s1430_s18 }
   0x6   : > { %p265_p1 = scmp.eq.s32.totalorder %s264_s25, 0  ;;  %p278_p2 = scmp.eq.s32.totalorder %s1525_s21, 1 }
   0x7   : > { %p283_p3 = scmp.ne.s32.totalorder %s1430_s18, %s1426_s17  ;;  %p284_p4 = scmp.eq.s32.totalorder %s1088_s22, 1 }
   0x8   : > { %s1540_s26 = scalar_select %p265_p1, %s1434_s19, %s267_s24  }
   0x9   : > { %p1542_p5 = por %p278_p2, %p277_p0  ;;  %p1546_p6 = por %p284_p4, %p283_p3 }
   0xa   : > { %p1091_p7 = scmp.ge.s32.totalorder %s1438_s20, 1  ;;  %p339_p8 = scmp.lt.s32.totalorder %s1438_s20, 3 }
   0xc   : > { %p340_p9 = pnand %p1091_p7, %p339_p8 }
   0xd   : > { %v383_v0 = vld [vmem:[%s1790_s1] sm:$0xff] (!%p340_p9)  ;;  %v384_v1 = vld [vmem:[%s1790_s1 + $0x8] sm:$0xff] (!%p340_p9)  ;;  %v385_v2 = vld [vmem:[%s1790_s1 + $0x10] sm:$0xff] (!%p340_p9)  ;;  %v1440_v3 = vmov (!%p340_p9), 0.0|0.0   ;;  %vm1441_vm0 = vmmov (!%p340_p9), 0   ;;  %v1442_v6 = vmov (!%p340_p9), 0.0   ;;  %v536_v39 = vlaneseq (!%p340_p9) }
   0xe   : > { %343 = sbr.rel (%p340_p9) target bundleno = 966 (0x3c6), region = 64  ;;  %1263 = vmatprep.subr.bf16.mxu0 (!%p340_p9), %v1440_v3  ;;  %v1264_v4 = vpack.c.bf16 (!%p340_p9), %v384_v1, %v383_v0  ;;  %v386_v5 = vld [vmem:[%s1790_s1 + $0x18] sm:$0xff] (!%p340_p9)  ;;  %1166 = vmatprep.mubr.msk.f32.mxu0 (!%p340_p9), %vm1441_vm0, %v1442_v6  ;;  %p378_p10 = scmp.lt.s32.totalorder (!%p340_p9), %s1525_s21, 1  ;;  %vm387_vm1 = vcmask (!%p340_p9), 261120   ;;  %v461_v9 = vld [vmem:[%s1791_s2] sm:$0xff] (!%p340_p9)  ;;  %v462_v10 = vld [vmem:[%s1791_s2 + $0x8] sm:$0xff] (!%p340_p9) }
   0xf   : > { %1269 = vmatprep.subr.bf16.mxu1 (!%p340_p9), %v1440_v3  ;;  %1177 = vmatprep.mubr.msk.f32.mxu1 (!%p340_p9), %vm1441_vm0, %v1442_v6  ;;  %v1267_v7 = vpack.c.bf16 (!%p340_p9), %v386_v5, %v385_v2  ;;  %v1270_v11 = vpack.c.bf16 (!%p340_p9), %v462_v10, %v461_v9  ;;  %v463_v12 = vld [vmem:[%s1791_s2 + $0x10] sm:$0xff] (!%p340_p9)  ;;  %v464_v13 = vld [vmem:[%s1791_s2 + $0x18] sm:$0xff] (!%p340_p9)  ;;  %v592_v15 = vld [vmem:[%s1794_s5] sm:$0xff] (!%p340_p9)  ;;  %v537_v40 = vshrl.u32 (!%p340_p9), %v536_v39, 7  ;;  %vm600_vm5 = vcmask (!%p340_p9), 523264   ;;  %s375_s15 = sand.u32 (!%p340_p9), 1, %s1430_s18  }
  0x10   : > { %1265 = vmatpush3.bf16.msra.mxu0 (!%p340_p9), %v1264_v4  ;;  %v1273_v14 = vpack.c.bf16 (!%p340_p9), %v464_v13, %v463_v12  ;;  %v593_v16 = vld [vmem:[%s1794_s5 + $0x8] sm:$0xff] (!%p340_p9)  ;;  %v674_v18 = vld [vmem:[%s1795_s6] sm:$0xff] (!%p340_p9)  ;;  %v594_v21 = vld [vmem:[%s1794_s5 + $0x10] sm:$0xff] (!%p340_p9)  ;;  %vm830_vm6 = vcmask (!%p340_p9), 130048   ;;  %s1092_s16 = sshll.u32 (!%p340_p9), %s375_s15, 3  ;;  %s1106_s22 = sshll.u32 (!%p340_p9), %s1525_s21, 7 }
  0x11   : > { %1266 = vmatprep.subr.bf16.mxu0 (!%p340_p9), %v1440_v3  ;;  %1271 = vmatpush3.bf16.msra.mxu1 (!%p340_p9), %v1270_v11  ;;  %v1276_v17 = vpack.c.bf16 (!%p340_p9), %v593_v16, %v592_v15  ;;  %v675_v19 = vld [vmem:[%s1795_s6 + $0x8] sm:$0xff] (!%p340_p9)  ;;  %v595_v22 = vld [vmem:[%s1794_s5 + $0x18] sm:$0xff] (!%p340_p9)  ;;  %v676_v24 = vld [vmem:[%s1795_s6 + $0x10] sm:$0xff] (!%p340_p9)  ;;  %v538_v41 = vsub.s32 (!%p340_p9), 3, %v537_v40  ;;  %v543_v43 = vand.u32 (!%p340_p9), 7, %v537_v40  ;;  %v551_v44 = vsub.s32 (!%p340_p9), 2, %v537_v40 }
  0x12   : > { %1272 = vmatprep.subr.bf16.mxu1 (!%p340_p9), %v1440_v3  ;;  %v1288_v20 = vpack.c.bf16 (!%p340_p9), %v675_v19, %v674_v18  ;;  %v1279_v23 = vpack.c.bf16 (!%p340_p9), %v595_v22, %v594_v21  ;;  %v677_v25 = vld [vmem:[%s1795_s6 + $0x18] sm:$0xff] (!%p340_p9)  ;;  %v596_v27 = vld [vmem:[%s1794_s5 + $0x20] sm:$0xff] (!%p340_p9)  ;;  %v597_v28 = vld [vmem:[%s1794_s5 + $0x28] sm:$0xff] (!%p340_p9)  ;;  %v562_v45 = vsub.s32 (!%p340_p9), 1, %v537_v40  ;;  %v573_v49 = vsub.s32 (!%p340_p9), 0, %v537_v40  ;;  %s1016_s13 = scalar_lea.sflag (!%p340_p9), [#allocation3], %s375_s15 }
  0x13   : > { %v1291_v26 = vpack.c.bf16 (!%p340_p9), %v677_v25, %v676_v24  ;;  %v678_v29 = vld [vmem:[%s1795_s6 + $0x20] sm:$0xff] (!%p340_p9)  ;;  %v1282_v30 = vpack.c.bf16 (!%p340_p9), %v597_v28, %v596_v27  ;;  %v679_v31 = vld [vmem:[%s1795_s6 + $0x28] sm:$0xff] (!%p340_p9)  ;;  %v598_v33 = vld [vmem:[%s1794_s5 + $0x30] sm:$0xff] (!%p340_p9)  ;;  %vm545_vm2 = vcmp.lt.s32.totalorder (!%p340_p9), %v543_v43, 1  ;;  %vm556_vm3 = vcmp.lt.s32.totalorder (!%p340_p9), %v543_v43, 2 }
  0x14   : > { %1268 = vmatpush3.bf16.msra.mxu0 (!%p340_p9), %v1267_v7  ;;  %v1294_v32 = vpack.c.bf16 (!%p340_p9), %v679_v31, %v678_v29  ;;  %v599_v34 = vld [vmem:[%s1794_s5 + $0x38] sm:$0xff] (!%p340_p9)  ;;  %v680_v35 = vld [vmem:[%s1795_s6 + $0x30] sm:$0xff] (!%p340_p9)  ;;  %v535_v42 = vld [vmem:[%s1792_s3] sm:$0xf] (!%p340_p9)  ;;  %vm567_vm4 = vcmp.lt.s32.totalorder (!%p340_p9), %v543_v43, 3 }
  0x15   : > { %s379_s24 = scalar_select %p378_p10, %s1525_s21, 1  ;;  %1275 = vmatprep.subr.bf16.mxu0 %v1440_v3  ;;  %1274 = vmatpush3.bf16.msra.mxu1 %v1273_v14  ;;  %v681_v36 = vld [vmem:[%s1795_s6 + $0x38] sm:$0xff]  ;;  %v1285_v37 = vpack.c.bf16 %v599_v34, %v598_v33  ;;  %v539_v46 = vrot.slane %v535_v42, %v538_v41  ;;  %v552_v48 = vrot.slane %v535_v42, %v551_v44  ;;  %v1096_v1 = vld [vmem:[%s1793_s4] ss:$0 sm:$0xff]  ;;  %v753_v10 = vld [vmem:[%s1796_s7 + $0x8] sm:$0xff] }
  0x16   : > { %1287 = vmatprep.subr.bf16.mxu1 %v1440_v3  ;;  %v1297_v38 = vpack.c.bf16 %v681_v36, %v680_v35  ;;  %v563_v54 = vrot.slane %v535_v42, %v562_v45  ;;  %v574_v59 = vrot.slane %v535_v42, %v573_v49  ;;  %v752_v9 = vld [vmem:[%s1796_s7] sm:$0xff]  ;;  %v754_v14 = vld [vmem:[%s1796_s7 + $0x10] sm:$0xff]  ;;  %v755_v15 = vld [vmem:[%s1796_s7 + $0x18] sm:$0xff]  ;;  %s1443_s21 = smov [#allocation2]  }
  0x17   : > { %s1093_s25 = sshll.u32 %s379_s24, 3  ;;  %v1300_v12 = vpack.c.bf16 %v753_v10, %v752_v9  ;;  %v1303_v16 = vpack.c.bf16 %v755_v15, %v754_v14  ;;  %v757_v18 = vld [vmem:[%s1796_s7 + $0x28] sm:$0xff]  ;;  %v759_v21 = vld [vmem:[%s1796_s7 + $0x38] sm:$0xff]  ;;  %v842_v25 = vld [vmem:[%s1797_s8] sm:$0xff]  ;;  %s377_s24 = scalar_lea.vmem [#allocation2], %s1092_s16 }
  0x18   : > { %s381_s12 = scalar_lea.vmem %s1789_s0, %s1093_s25  ;;  %v933_v42 = vld [vmem:[%s1799_s10] sm:$0xff]  ;;  %v934_v43 = vld [vmem:[%s1799_s10 + $0x8] sm:$0xff]  ;;  %s1029_s25 = sshll.u32 %s377_s24, 4  ;;  %s1748_s25 = int_to_ptr.vmem [resolvable:$true] %s1029_s25 }
  0x19   : > { %v382_v8 = vld [vmem:[%s381_s12] sm:$0xff]  ;;  %v1315_v45 = vpack.c.bf16 %v934_v43, %v933_v42  ;;  %s1746_s12 = scalar_lea.hbm %s1800_s11, %s1106_s22  ;;  %s1376_s14 = scalar_lea.vmem %s1748_s25, 128 }
  0x1a   : > { %1167 = vmatmul.mubr.msk.f32.vlgmr.msra.gmra.mrb[0].mxu0 %vm387_vm1, %v382_v8  ;;  %1178 = vmatmul.mubr.msk.f32.vlgmr.msra.gmra.mrb[0].mxu1 %vm387_vm1, %v382_v8  ;;  %p1377_p11 = scmp.ne.s32.totalorder %s1748_s25, %s1376_s14  ;;  %s1380_s16 = sshll.u32 %s1443_s21, 4  ;;  %s1381_s16 = int_to_ptr.vmem [resolvable:$false] %s1380_s16 }
  0x1b   : > { %1196 = vmatprep.mubr.msk.f32.mxu0 %vm1441_vm0, %v1442_v6  ;;  %1277 = vmatpush3.bf16.msra.mxu0 %v1276_v17  ;;  %v756_v17 = vld [vmem:[%s1796_s7 + $0x20] sm:$0xff]  ;;  %s1382_s22 = scalar_lea.vmem %s1381_s16, 256  ;;  %p1383_p0 = scmp.lt.s32.totalorder %s1748_s25, %s1381_s16 }
  0x1c   : > { %1289 = vmatpush3.bf16.msra.mxu1 %v1288_v20  ;;  %1278 = vmatprep.subr.bf16.mxu0 %v1440_v3  ;;  %v1306_v19 = vpack.c.bf16 %v757_v18, %v756_v17  ;;  %v758_v20 = vld [vmem:[%s1796_s7 + $0x30] sm:$0xff]  ;;  %p1378_p12 = pnand %p1377_p11, %p1542_p5  ;;  %p1384_p1 = scmp.lt.s32.totalorder %s1382_s22, %s1376_s14 }
  0x1d   : > { %1290 = vmatprep.subr.bf16.mxu1 %v1440_v3  ;;  %1215 = vmatprep.mubr.msk.f32.mxu1 %vm1441_vm0, %v1442_v6  ;;  %v1309_v22 = vpack.c.bf16 %v759_v21, %v758_v20 }
  0x1e   : > { %p1379_p13 = pneg %p1378_p12  ;;  %p1385_p2 = por %p1384_p1, %p1383_p0 }
  0x1f   : > { %1280 = vmatpush3.bf16.msra.mxu0 %v1279_v23 }
  0x20   : > { %1292 = vmatpush3.bf16.msra.mxu1 %v1291_v26  ;;  %1281 = vmatprep.subr.bf16.mxu0 %v1440_v3  ;;  %v843_v26 = vld [vmem:[%s1797_s8 + $0x8] sm:$0xff]  ;;  %p1386_p3 = pnand %p1385_p2, %p1379_p13 }
  0x21   : > { %1293 = vmatprep.subr.bf16.mxu1 %v1440_v3  ;;  %v1312_v27 = vpack.c.bf16 %v843_v26, %v842_v25 }
  0x23   : > { %1283 = vmatpush3.bf16.msra.mxu0 %v1282_v30 }
  0x24   : > { %1295 = vmatpush3.bf16.msra.mxu1 %v1294_v32  ;;  %1284 = vmatprep.subr.bf16.mxu0 %v1440_v3 }
  0x25   : > { %1296 = vmatprep.subr.bf16.mxu1 %v1440_v3 }
  0x27   : > { %1286 = vmatpush3.bf16.msra.mxu0 %v1285_v37 }
  0x28   : > { %1298 = vmatpush3.bf16.msra.mxu1 %v1297_v38  ;;  %1299 = vmatprep.subr.bf16.mxu0 %v1440_v3 }
  0x29   : > { %1311 = vmatprep.subr.bf16.mxu1 %v1440_v3 }
  0xed   : > { %v457_v47 = vpop.f32.mrb[0].mxu0  ;;  %v531_v23 = vpop.f32.mrb[0].mxu1 }
  0xee   : > { %v544_v50 = vrot.slane %v457_v47, 7  ;;  %v555_v51 = vrot.slane %v457_v47, 6  ;;  %v566_v52 = vrot.slane %v457_v47, 5  ;;  %v1168_v53 = vpop.f32.mrb[1].mxu0  ;;  %v540_v57 = vmul.f32 %v539_v46, %v457_v47  ;;  %v1179_v24 = vpop.f32.mrb[1].mxu1  ;;  %v935_v47 = vld [vmem:[%s1799_s10 + $0x10] sm:$0xff] }
  0xef   : > { %v940_v53 = vld [vmem:[%s1799_s10 + $0x38] sm:$0xff] }
  0xf0   : > { %v548_v55 = vsel %vm545_vm2, 0.0, %v544_v50  ;;  %v559_v56 = vsel %vm556_vm3, 0.0, %v555_v51  ;;  %v570_v60 = vsel %vm567_vm4, 0.0, %v566_v52  ;;  %v937_v50 = vld [vmem:[%s1799_s10 + $0x20] sm:$0xff]  ;;  %v938_v51 = vld [vmem:[%s1799_s10 + $0x28] sm:$0xff] }
  0xf1   : > { %v553_v58 = vmul.f32 %v552_v48, %v548_v55  ;;  %v564_v62 = vmul.f32 %v563_v54, %v559_v56  ;;  %v575_v0 = vmul.f32 %v574_v59, %v570_v60  ;;  %v936_v48 = vld [vmem:[%s1799_s10 + $0x18] sm:$0xff]  ;;  %v1321_v52 = vpack.c.bf16 %v938_v51, %v937_v50 }
  0xf2   : > { %v1318_v49 = vpack.c.bf16 %v936_v48, %v935_v47  ;;  %v1103_v55 = vmul.f32 -1.442695, %v531_v23 }
  0xf3   : > { %v554_v61 = vadd.f32 %v553_v58, %v540_v57 }
  0xf5   : > { %v565_v63 = vadd.f32 %v564_v62, %v554_v61 }
  0xf7   : > { %v576_v2 = vadd.f32 %v575_v0, %v565_v63 }
  0xf9   : > { %v584_v4 = vadd.f32 %v1096_v1, %v576_v2 }
  0xfb   : > { %v1097_v5 = vmul.f32 -1.442695, %v584_v4 }
  0xfd   : > { %1368 = vpow2.f32 %v1097_v5 }
 0x107   : > { %v1369_v7 = vpop.eup %1368 }
 0x108   : > { %v588_v8 = vadd.f32 1.0, %v1369_v7 }
 0x10a   : > { %1370 = vrcp.f32 %v588_v8 }
 0x10b   : > { %1372 = vpow2.f32 %v1103_v55 }
 0x114   : > { %v1371_v11 = vpop.eup %1370 }
 0x115   : > { %v1665_v13 = vmul.f32 %v1371_v11, %v584_v4  ;;  %v1373_v56 = vpop.eup %1372 }
 0x116   : > { %v928_v57 = vadd.f32 1.0, %v1373_v56 }
 0x117   : > { %1197 = vmatmul.mubr.msk.f32.vlgmr.msra.gmra.mrb[2].mxu0 %vm600_vm5, %v1665_v13  ;;  %1216 = vmatmul.mubr.msk.f32.vlgmr.msra.gmra.mrb[2].mxu1 %vm600_vm5, %v1665_v13 }
 0x118   : > { %1301 = vmatpush3.bf16.msra.mxu0 %v1300_v12  ;;  %1234 = vmatprep.mubr.msk.f32.mxu0 %vm1441_vm0, %v1442_v6  ;;  %1374 = vrcp.f32 %v928_v57 }
 0x119   : > { %1302 = vmatprep.subr.bf16.mxu0 %v1440_v3  ;;  %1241 = vmatprep.mubr.msk.f32.mxu1 %vm1441_vm0, %v1442_v6 }
 0x11a   : > { %1313 = vmatpush3.bf16.msra.mxu1 %v1312_v27 }
 0x11b   : > { %1314 = vmatprep.subr.bf16.mxu1 %v1440_v3 }
 0x11c   : > { %1304 = vmatpush3.bf16.msra.mxu0 %v1303_v16 }
 0x11d   : > { %1305 = vmatprep.subr.bf16.mxu0 %v1440_v3 }
 0x120   : > { %1307 = vmatpush3.bf16.msra.mxu0 %v1306_v19 }
 0x121   : > { %1308 = vmatprep.subr.bf16.mxu0 %v1440_v3 }
 0x122   : > { %v1375_v58 = vpop.eup %1374 }
 0x123   : > { %v931_v61 = vmul.f32 %v1375_v58, %v531_v23 }
 0x124   : > { %1310 = vmatpush3.bf16.msra.mxu0 %v1309_v22 }
 0x127   : > { %1235 = vmatmul.mubr.msk.f32.vlgmr.msra.gmra.mrb[4].mxu0 %vm600_vm5, %v1665_v13 }
 0x1ea   : > { %v670_v28 = vpop.f32.mrb[2].mxu0  ;;  %v748_v29 = vpop.f32.mrb[2].mxu1 }
 0x1eb   : > { %v840_v30 = vmul.f32 %v748_v29, %v670_v28  ;;  %v1198_v31 = vpop.f32.mrb[3].mxu0  ;;  %v1217_v32 = vpop.f32.mrb[3].mxu1 }
 0x1fa   : > { %v826_v33 = vpop.f32.mrb[4].mxu0 }
 0x1fb   : > { %v831_v34 = vsel %vm830_vm6, %v826_v33, 0.0  ;;  %v1236_v35 = vpop.f32.mrb[5].mxu0 }
 0x1fc   : > { %v832_v36 = vrot.slane %v831_v34, 4 }
 0x1fe   : > { %v833_v37 = vadd.f32 %v832_v36, %v831_v34 }
 0x200   : > { %v834_v38 = vrot.slane %v833_v37, 2 }
 0x202   : > { %v835_v39 = vadd.f32 %v834_v38, %v833_v37 }
 0x204   : > { %v836_v40 = vrot.slane %v835_v39, 1 }
 0x206   : > { %v837_v41 = vadd.f32 %v836_v40, %v835_v39 }
 0x208   : > { %v839_v44 = vmul.f32 0.125, %v837_v41 }
 0x20a   : > { %v841_v46 = vmul.f32 %v840_v30, %v839_v44 }
 0x20c   : > { %1242 = vmatmul.mubr.msk.f32.vlgmr.msra.gmra.mrb[4].mxu1 %vm830_vm6, %v841_v46 }
 0x20d   : > { %1316 = vmatpush3.bf16.msra.mxu1 %v1315_v45  ;;  %1260 = vmatprep.mubr.msk.f32.mxu1 %vm1441_vm0, %v1442_v6  ;;  %v939_v6 = vld [vmem:[%s1799_s10 + $0x30] sm:$0xff] }
 0x20e   : > { %1317 = vmatprep.subr.bf16.mxu1 %v1440_v3  ;;  %v1324_v54 = vpack.c.bf16 %v940_v53, %v939_v6 }
 0x211   : > { %1319 = vmatpush3.bf16.msra.mxu1 %v1318_v49 }
 0x212   : > { %1320 = vmatprep.subr.bf16.mxu1 %v1440_v3 }
 0x215   : > { %1322 = vmatpush3.bf16.msra.mxu1 %v1321_v52 }
 0x216   : > { %1323 = vmatprep.subr.bf16.mxu1 %v1440_v3  ;;  %v1101_v3 = vld [vmem:[%s1798_s9] ss:$0 sm:$0xff] }
 0x217   : > { %v851_v59 = vmul.f32 %v1101_v3, %v1665_v13 }
 0x219   : > { %1325 = vmatpush3.bf16.msra.mxu1 %v1324_v54 }
 0x2df   : > { %v921_v60 = vpop.f32.mrb[4].mxu1 }
 0x2e0   : > { %v922_v62 = vadd.f32 %v921_v60, %v851_v59  ;;  %v1243_v63 = vpop.f32.mrb[5].mxu1 }
 0x2e2   : > { %v932_v0 = vmul.f32 %v931_v61, %v922_v62 }
 0x2e4   : > { %1261 = vmatmul.mubr.msk.f32.vlgmr.msra.gmra.mrb[6].mxu1 %vm600_vm5, %v932_v0 }
 0x3b7   : > { %v1010_v1 = vpop.f32.mrb[6].mxu1 }
 0x3b8   : > { %1014 = vst.msk [vmem:[%s377_s24] sm:$0xff] %vm387_vm1, %v1010_v1  ;;  %v1262_v2 = vpop.f32.mrb[7].mxu1 }
 0x3b9   : > { %1389 = shalt.err (!%p1386_p3)
}
 0x3ba   : > { %s1390_s15 = scalar_lea.hbm %s1746_s12, 128  ;;  %s1394_s30 = scalar_lea.hbm %s1800_s11, 256 }
 0x3bb   : > { %p1391_p4 = scmp.ne.s32.totalorder %s1746_s12, %s1390_s15  ;;  %p1395_p9 = scmp.lt.u32.totalorder %s1746_s12, %s1800_s11 }
 0x3bc   : > { %p1396_p10 = scmp.lt.u32.totalorder %s1394_s30, %s1390_s15  ;;  %p1398_p12 = scmp.lt.u32.totalorder %s1390_s15, %s1746_s12 }
 0x3bd   : > { %p1392_p7 = pnand %p1391_p4, %p1542_p5 }
 0x3be   : > { %p1397_p11 = por %p1396_p10, %p1395_p9 }
 0x3bf   : > { %p1393_p8 = pneg %p1392_p7 }
 0x3c0   : > { %p1399_p13 = por %p1398_p12, %p1397_p11 }
 0x3c2   : > { %p1400_p0 = pnand %p1399_p13, %p1393_p8 }
 0x3c4   : > { %1403 = shalt.err (!%p1400_p0)
}
 0x3c5   : > { %1326 = dma.vmem_to_hbm [thread:$0]  (%p1542_p5), %s1748_s25, 128, %s1746_s12, %s1016_s13  }
 0x3c6 PF: > { %p1332_p1 = scmp.ge.s32.totalorder %s1438_s20, 2  ;;  %s1041_s14 = sand.u32 1, %s1426_s17  }
 0x3c7   : > { %s1042_s22 = scalar_lea.sflag [#allocation3], %s1041_s14 }
 0x3c8   : > { %p1329_p2 = pnand %p1332_p1, %p1546_p6 }
 0x3ca   : > { %1421 = dma.done.wait (!%p1329_p2), %s1042_s22, 128  }
 0x3cb   : > { %1423 = vsyncadd (!%p1329_p2), %s1042_s22, 4294967168  ;;  %p21_p3 = scmp.ge.s32.totalorder %s1529_s23, 4   ;;  %s1803_s17 = smov %s1430_s18 }
 0x3cc   : > { %s1804_s18 = smov %s1434_s19  ;;  %s1805_s19 = smov %s1540_s26 }
 0x3cd   : > { %s1806_s20 = smov %s1529_s23  ;;  %23 = sbr.rel (!%p21_p3) target bundleno = 3 (0x3), region = 99 }
 0x3d4   :  { %1047 = vsyncpa [#allocation3], 1 }
 0x3d5   :  { %1049 = vsyncpa [#allocation3 + $0x1], 1 }

</bundles_post_ra>
